<compile_context>
chip_gen: v5e
topology: v5e:2x2
jax: 0.10.0
libtpu: 0.0.40
codegen_flags: <defaults>
</compile_context>

<pallas_src>
import jax
import jax.numpy as jnp
from jax.experimental import pallas as pl
from jax.experimental.pallas import tpu as pltpu


def _round_up(x, m):
    return (x + m - 1) // m * m


def _fused_downproj_kernel(rbf_ref, w_ref, sph_ref, perm_ref, rbfw_ref, spht_ref):
    # rbf_ref  : (S, tE, R)    edge tile of the radial basis, per spherical order
    # w_ref    : (S, R, I*S)   interleaved block weight (VMEM resident)
    # sph_ref  : (tE, S*K)     flattened spherical basis tile
    # perm_ref : (S*K, K*S)    0/1 permutation matrix (VMEM resident)
    # rbfw_ref : (tE, I*S)     lane-dense output; column i*S + s == rbf_W1[e, i, s]
    # spht_ref : (tE, K*S)     lane-dense output; column k*S + s == sph_t[e, k, s]
    num_spherical = rbf_ref.shape[0]

    # S accumulated MXU dots (static unroll; S is small). The zero-interleaved
    # columns of w_ref make the MXU do the (S,E,I)->(E,I,S) permute for free.
    rbfw_ref[...] = jnp.dot(
        rbf_ref[0], w_ref[0], preferred_element_type=jnp.float32
    ).astype(rbfw_ref.dtype)
    for s in range(1, num_spherical):
        rbfw_ref[...] += jnp.dot(
            rbf_ref[s], w_ref[s], preferred_element_type=jnp.float32
        ).astype(rbfw_ref.dtype)

    # sph transpose as an exact permutation matmul (MXU does the lane shuffle,
    # avoiding a lane-sparse XLU / XLA transpose with minor dim S).
    spht_ref[...] = jnp.dot(
        sph_ref[...], perm_ref[...],
        precision=jax.lax.Precision.HIGHEST,
        preferred_element_type=jnp.float32,
    ).astype(spht_ref.dtype)


def efficient_interaction_down_projection(rbf_env, sph, weight, *, tile_edges=512):
    """
    rbf_env : (S, E, R) float32
    sph     : (E, S, K) float32
    weight  : (S, R, I) float32
    returns (rbf_W1: (E, I, S), sph_t: (E, K, S))
    """
    S, E, R = rbf_env.shape
    Sw, Rw, I = weight.shape
    Es, Ss, K = sph.shape
    assert (S, R) == (Sw, Rw) and (E, S) == (Es, Ss)
    assert tile_edges % 8 == 0
    dtype = rbf_env.dtype

    # --- one-time parameter packing (wrapper-side, tiny) -------------------
    # Interleaved block weight: W_int[s, r, i*S + t] = weight[s, r, i] * (s == t)
    eye_s = jnp.eye(S, dtype=dtype)
    w_int = (weight[:, :, :, None] * eye_s[:, None, None, :]).reshape(S, R, I * S)

    # Permutation matrix: P[s*K + k, k*S + s] = 1  (sph (S,K)-flat -> (K,S)-flat)
    sk = jnp.arange(S * K)
    cols = (sk % K) * S + (sk // K)
    perm = jax.nn.one_hot(cols, K * S, dtype=dtype)

    sph_flat = sph.reshape(E, S * K)

    # --- edge tiling (bounded VMEM, parallel across v7x TensorCores) -------
    tE = min(tile_edges, _round_up(E, 8))
    E_pad = _round_up(E, tE)
    if E_pad != E:
        rbf_env_p = jnp.pad(rbf_env, ((0, 0), (0, E_pad - E), (0, 0)))
        sph_flat_p = jnp.pad(sph_flat, ((0, E_pad - E), (0, 0)))
    else:
        rbf_env_p, sph_flat_p = rbf_env, sph_flat
    n_tiles = E_pad // tE

    flops = 2 * S * E_pad * R * (I * S) + 2 * E_pad * (S * K) * (K * S)
    bytes_accessed = 4 * (
        S * E_pad * R + S * R * I * S + E_pad * S * K + S * K * K * S
        + E_pad * I * S + E_pad * K * S
    )

    rbfw_flat, spht_flat = pl.pallas_call(
        _fused_downproj_kernel,
        out_shape=(
            jax.ShapeDtypeStruct((E_pad, I * S), dtype),
            jax.ShapeDtypeStruct((E_pad, K * S), dtype),
        ),
        grid_spec=pltpu.PrefetchScalarGridSpec(
            num_scalar_prefetch=0,
            grid=(n_tiles,),
            in_specs=[
                pl.BlockSpec((S, tE, R), lambda e: (0, e, 0)),
                pl.BlockSpec((S, R, I * S), lambda e: (0, 0, 0)),   # resident
                pl.BlockSpec((tE, S * K), lambda e: (e, 0)),
                pl.BlockSpec((S * K, K * S), lambda e: (0, 0)),     # resident
            ],
            out_specs=[
                pl.BlockSpec((tE, I * S), lambda e: (e, 0)),
                pl.BlockSpec((tE, K * S), lambda e: (e, 0)),
            ],
        ),
        compiler_params=pltpu.CompilerParams(
            dimension_semantics=("parallel",),
        ),
        cost_estimate=pl.CostEstimate(
            flops=flops, transcendentals=0, bytes_accessed=bytes_accessed
        ),
    )(rbf_env_p, w_int, sph_flat_p, perm)

    # Row-major reshapes only (free) -- no lane-sparse transposes.
    rbf_W1 = rbfw_flat[:E].reshape(E, I, S)
    sph_t = spht_flat[:E].reshape(E, K, S)
    return rbf_W1, sph_t


def he_style_init(key, shape):
    # Deterministic He-scaled init (stand-in for he_orthogonal_init).
    # TODO(synk): full orthogonalization (QR per fan-in slice) omitted; scale-only init.
    fan_in = shape[1]  # num_radial
    w = jax.random.normal(key, shape, dtype=jnp.float32)
    return w * jnp.sqrt(1.0 / fan_in)


if __name__ == "__main__":
    num_spherical = 7
    num_radial = 16
    emb_size_interm = 32
    n_edges = 64
    kmax = 8

    key = jax.random.PRNGKey(0)
    k_w, k_rbf, k_sph = jax.random.split(key, 3)

    weight = he_style_init(k_w, (num_spherical, num_radial, emb_size_interm))
    rbf_env = jax.random.normal(
        k_rbf, (num_spherical, n_edges, num_radial), dtype=jnp.float32
    )
    sph = jax.random.normal(
        k_sph, (n_edges, num_spherical, kmax), dtype=jnp.float32
    )

    rbf_W1, sph_t = efficient_interaction_down_projection(rbf_env, sph, weight)
    jax.block_until_ready((rbf_W1, sph_t))

    # Reference check against plain JAX (mirrors the torch ops).
    ref_rbf_W1 = jnp.transpose(jnp.matmul(rbf_env, weight), (1, 2, 0))
    ref_sph = jnp.transpose(sph, (0, 2, 1))

    assert rbf_W1.shape == (n_edges, emb_size_interm, num_spherical), rbf_W1.shape
    assert sph_t.shape == (n_edges, kmax, num_spherical), sph_t.shape
    assert jnp.allclose(rbf_W1, ref_rbf_W1, atol=1e-5, rtol=1e-5)
    assert jnp.allclose(sph_t, ref_sph, atol=1e-5, rtol=1e-5)

    print("KERNEL_OK")
</pallas_src>

<mosaic_0001>
module attributes {stable_mosaic.version = 11 : i64} {
  func.func @_fused_downproj_kernel(%arg0: i32, %arg1: memref<7x64x16xf32, #tpu.memory_space<vmem>>, %arg2: memref<7x16x224xf32, #tpu.memory_space<vmem>>, %arg3: memref<64x56xf32, #tpu.memory_space<vmem>>, %arg4: memref<56x56xf32, #tpu.memory_space<vmem>>, %arg5: memref<64x224xf32, #tpu.memory_space<vmem>>, %arg6: memref<64x56xf32, #tpu.memory_space<vmem>>) attributes {dimension_semantics = [#tpu.dimension_semantics<parallel>], iteration_bounds = array<i64: 1>, scalar_prefetch = 0 : i64, scratch_operands = 0 : i64, tpu.core_type = #tpu.core_type<tc>, window_params = [{transform_indices = @transform_0, window_bounds = array<i64: 7, 64, 16>}, {pipeline_mode = #tpu.pipeline_mode<synchronous>, transform_indices = @transform_1, window_bounds = array<i64: 7, 16, 224>}, {transform_indices = @transform_2, window_bounds = array<i64: 64, 56>}, {pipeline_mode = #tpu.pipeline_mode<synchronous>, transform_indices = @transform_3, window_bounds = array<i64: 56, 56>}, {transform_indices = @transform_4, window_bounds = array<i64: 64, 224>}, {transform_indices = @transform_5, window_bounds = array<i64: 64, 56>}]} {
    %c0 = arith.constant 0 : index
    %c0_0 = arith.constant 0 : index
    %c0_1 = arith.constant 0 : index
    %0 = vector.load %arg1[%c0, %c0_0, %c0_1] : memref<7x64x16xf32, #tpu.memory_space<vmem>>, vector<1x64x16xf32>
    %1 = vector.shape_cast %0 : vector<1x64x16xf32> to vector<64x16xf32>
    %c0_2 = arith.constant 0 : index
    %c0_3 = arith.constant 0 : index
    %c0_4 = arith.constant 0 : index
    %2 = vector.load %arg2[%c0_2, %c0_3, %c0_4] : memref<7x16x224xf32, #tpu.memory_space<vmem>>, vector<1x16x224xf32>
    %3 = vector.shape_cast %2 : vector<1x16x224xf32> to vector<16x224xf32>
    %cst = arith.constant dense<0.000000e+00> : vector<64x224xf32>
    %4 = tpu.matmul %1, %3, %cst {dimension_numbers = #tpu.dot_dimension_numbers<[1], [0], [0], [1], [0, 0, 1, 1], [], []>} : vector<64x16xf32>, vector<16x224xf32>, vector<64x224xf32> -> vector<64x224xf32>
    %c0_5 = arith.constant 0 : index
    %c0_6 = arith.constant 0 : index
    %5 = vector.load %arg5[%c0_5, %c0_6] : memref<64x224xf32, #tpu.memory_space<vmem>>, vector<64x224xf32>
    tpu.vector_store %arg5[%c0_5, %c0_6], %4 {strides = array<i32>} : memref<64x224xf32, #tpu.memory_space<vmem>>, vector<64x224xf32>,
    %c0_7 = arith.constant 0 : index
    %c0_8 = arith.constant 0 : index
    %6 = vector.load %arg5[%c0_7, %c0_8] : memref<64x224xf32, #tpu.memory_space<vmem>>, vector<64x224xf32>
    %c1 = arith.constant 1 : index
    %c0_9 = arith.constant 0 : index
    %c0_10 = arith.constant 0 : index
    %7 = vector.load %arg1[%c1, %c0_9, %c0_10] : memref<7x64x16xf32, #tpu.memory_space<vmem>>, vector<1x64x16xf32>
    %8 = vector.shape_cast %7 : vector<1x64x16xf32> to vector<64x16xf32>
    %c1_11 = arith.constant 1 : index
    %c0_12 = arith.constant 0 : index
    %c0_13 = arith.constant 0 : index
    %9 = vector.load %arg2[%c1_11, %c0_12, %c0_13] : memref<7x16x224xf32, #tpu.memory_space<vmem>>, vector<1x16x224xf32>
    %10 = vector.shape_cast %9 : vector<1x16x224xf32> to vector<16x224xf32>
    %cst_14 = arith.constant dense<0.000000e+00> : vector<64x224xf32>
    %11 = tpu.matmul %8, %10, %cst_14 {dimension_numbers = #tpu.dot_dimension_numbers<[1], [0], [0], [1], [0, 0, 1, 1], [], []>} : vector<64x16xf32>, vector<16x224xf32>, vector<64x224xf32> -> vector<64x224xf32>
    %12 = arith.addf %6, %11 : vector<64x224xf32>
    %c0_15 = arith.constant 0 : index
    %c0_16 = arith.constant 0 : index
    %13 = vector.load %arg5[%c0_15, %c0_16] : memref<64x224xf32, #tpu.memory_space<vmem>>, vector<64x224xf32>
    tpu.vector_store %arg5[%c0_15, %c0_16], %12 {strides = array<i32>} : memref<64x224xf32, #tpu.memory_space<vmem>>, vector<64x224xf32>,
    %c0_17 = arith.constant 0 : index
    %c0_18 = arith.constant 0 : index
    %14 = vector.load %arg5[%c0_17, %c0_18] : memref<64x224xf32, #tpu.memory_space<vmem>>, vector<64x224xf32>
    %c2 = arith.constant 2 : index
    %c0_19 = arith.constant 0 : index
    %c0_20 = arith.constant 0 : index
    %15 = vector.load %arg1[%c2, %c0_19, %c0_20] : memref<7x64x16xf32, #tpu.memory_space<vmem>>, vector<1x64x16xf32>
    %16 = vector.shape_cast %15 : vector<1x64x16xf32> to vector<64x16xf32>
    %c2_21 = arith.constant 2 : index
    %c0_22 = arith.constant 0 : index
    %c0_23 = arith.constant 0 : index
    %17 = vector.load %arg2[%c2_21, %c0_22, %c0_23] : memref<7x16x224xf32, #tpu.memory_space<vmem>>, vector<1x16x224xf32>
    %18 = vector.shape_cast %17 : vector<1x16x224xf32> to vector<16x224xf32>
    %cst_24 = arith.constant dense<0.000000e+00> : vector<64x224xf32>
    %19 = tpu.matmul %16, %18, %cst_24 {dimension_numbers = #tpu.dot_dimension_numbers<[1], [0], [0], [1], [0, 0, 1, 1], [], []>} : vector<64x16xf32>, vector<16x224xf32>, vector<64x224xf32> -> vector<64x224xf32>
    %20 = arith.addf %14, %19 : vector<64x224xf32>
    %c0_25 = arith.constant 0 : index
    %c0_26 = arith.constant 0 : index
    %21 = vector.load %arg5[%c0_25, %c0_26] : memref<64x224xf32, #tpu.memory_space<vmem>>, vector<64x224xf32>
    tpu.vector_store %arg5[%c0_25, %c0_26], %20 {strides = array<i32>} : memref<64x224xf32, #tpu.memory_space<vmem>>, vector<64x224xf32>,
    %c0_27 = arith.constant 0 : index
    %c0_28 = arith.constant 0 : index
    %22 = vector.load %arg5[%c0_27, %c0_28] : memref<64x224xf32, #tpu.memory_space<vmem>>, vector<64x224xf32>
    %c3 = arith.constant 3 : index
    %c0_29 = arith.constant 0 : index
    %c0_30 = arith.constant 0 : index
    %23 = vector.load %arg1[%c3, %c0_29, %c0_30] : memref<7x64x16xf32, #tpu.memory_space<vmem>>, vector<1x64x16xf32>
    %24 = vector.shape_cast %23 : vector<1x64x16xf32> to vector<64x16xf32>
    %c3_31 = arith.constant 3 : index
    %c0_32 = arith.constant 0 : index
    %c0_33 = arith.constant 0 : index
    %25 = vector.load %arg2[%c3_31, %c0_32, %c0_33] : memref<7x16x224xf32, #tpu.memory_space<vmem>>, vector<1x16x224xf32>
    %26 = vector.shape_cast %25 : vector<1x16x224xf32> to vector<16x224xf32>
    %cst_34 = arith.constant dense<0.000000e+00> : vector<64x224xf32>
    %27 = tpu.matmul %24, %26, %cst_34 {dimension_numbers = #tpu.dot_dimension_numbers<[1], [0], [0], [1], [0, 0, 1, 1], [], []>} : vector<64x16xf32>, vector<16x224xf32>, vector<64x224xf32> -> vector<64x224xf32>
    %28 = arith.addf %22, %27 : vector<64x224xf32>
    %c0_35 = arith.constant 0 : index
    %c0_36 = arith.constant 0 : index
    %29 = vector.load %arg5[%c0_35, %c0_36] : memref<64x224xf32, #tpu.memory_space<vmem>>, vector<64x224xf32>
    tpu.vector_store %arg5[%c0_35, %c0_36], %28 {strides = array<i32>} : memref<64x224xf32, #tpu.memory_space<vmem>>, vector<64x224xf32>,
    %c0_37 = arith.constant 0 : index
    %c0_38 = arith.constant 0 : index
    %30 = vector.load %arg5[%c0_37, %c0_38] : memref<64x224xf32, #tpu.memory_space<vmem>>, vector<64x224xf32>
    %c4 = arith.constant 4 : index
    %c0_39 = arith.constant 0 : index
    %c0_40 = arith.constant 0 : index
    %31 = vector.load %arg1[%c4, %c0_39, %c0_40] : memref<7x64x16xf32, #tpu.memory_space<vmem>>, vector<1x64x16xf32>
    %32 = vector.shape_cast %31 : vector<1x64x16xf32> to vector<64x16xf32>
    %c4_41 = arith.constant 4 : index
    %c0_42 = arith.constant 0 : index
    %c0_43 = arith.constant 0 : index
    %33 = vector.load %arg2[%c4_41, %c0_42, %c0_43] : memref<7x16x224xf32, #tpu.memory_space<vmem>>, vector<1x16x224xf32>
    %34 = vector.shape_cast %33 : vector<1x16x224xf32> to vector<16x224xf32>
    %cst_44 = arith.constant dense<0.000000e+00> : vector<64x224xf32>
    %35 = tpu.matmul %32, %34, %cst_44 {dimension_numbers = #tpu.dot_dimension_numbers<[1], [0], [0], [1], [0, 0, 1, 1], [], []>} : vector<64x16xf32>, vector<16x224xf32>, vector<64x224xf32> -> vector<64x224xf32>
    %36 = arith.addf %30, %35 : vector<64x224xf32>
    %c0_45 = arith.constant 0 : index
    %c0_46 = arith.constant 0 : index
    %37 = vector.load %arg5[%c0_45, %c0_46] : memref<64x224xf32, #tpu.memory_space<vmem>>, vector<64x224xf32>
    tpu.vector_store %arg5[%c0_45, %c0_46], %36 {strides = array<i32>} : memref<64x224xf32, #tpu.memory_space<vmem>>, vector<64x224xf32>,
    %c0_47 = arith.constant 0 : index
    %c0_48 = arith.constant 0 : index
    %38 = vector.load %arg5[%c0_47, %c0_48] : memref<64x224xf32, #tpu.memory_space<vmem>>, vector<64x224xf32>
    %c5 = arith.constant 5 : index
    %c0_49 = arith.constant 0 : index
    %c0_50 = arith.constant 0 : index
    %39 = vector.load %arg1[%c5, %c0_49, %c0_50] : memref<7x64x16xf32, #tpu.memory_space<vmem>>, vector<1x64x16xf32>
    %40 = vector.shape_cast %39 : vector<1x64x16xf32> to vector<64x16xf32>
    %c5_51 = arith.constant 5 : index
    %c0_52 = arith.constant 0 : index
    %c0_53 = arith.constant 0 : index
    %41 = vector.load %arg2[%c5_51, %c0_52, %c0_53] : memref<7x16x224xf32, #tpu.memory_space<vmem>>, vector<1x16x224xf32>
    %42 = vector.shape_cast %41 : vector<1x16x224xf32> to vector<16x224xf32>
    %cst_54 = arith.constant dense<0.000000e+00> : vector<64x224xf32>
    %43 = tpu.matmul %40, %42, %cst_54 {dimension_numbers = #tpu.dot_dimension_numbers<[1], [0], [0], [1], [0, 0, 1, 1], [], []>} : vector<64x16xf32>, vector<16x224xf32>, vector<64x224xf32> -> vector<64x224xf32>
    %44 = arith.addf %38, %43 : vector<64x224xf32>
    %c0_55 = arith.constant 0 : index
    %c0_56 = arith.constant 0 : index
    %45 = vector.load %arg5[%c0_55, %c0_56] : memref<64x224xf32, #tpu.memory_space<vmem>>, vector<64x224xf32>
    tpu.vector_store %arg5[%c0_55, %c0_56], %44 {strides = array<i32>} : memref<64x224xf32, #tpu.memory_space<vmem>>, vector<64x224xf32>,
    %c0_57 = arith.constant 0 : index
    %c0_58 = arith.constant 0 : index
    %46 = vector.load %arg5[%c0_57, %c0_58] : memref<64x224xf32, #tpu.memory_space<vmem>>, vector<64x224xf32>
    %c6 = arith.constant 6 : index
    %c0_59 = arith.constant 0 : index
    %c0_60 = arith.constant 0 : index
    %47 = vector.load %arg1[%c6, %c0_59, %c0_60] : memref<7x64x16xf32, #tpu.memory_space<vmem>>, vector<1x64x16xf32>
    %48 = vector.shape_cast %47 : vector<1x64x16xf32> to vector<64x16xf32>
    %c6_61 = arith.constant 6 : index
    %c0_62 = arith.constant 0 : index
    %c0_63 = arith.constant 0 : index
    %49 = vector.load %arg2[%c6_61, %c0_62, %c0_63] : memref<7x16x224xf32, #tpu.memory_space<vmem>>, vector<1x16x224xf32>
    %50 = vector.shape_cast %49 : vector<1x16x224xf32> to vector<16x224xf32>
    %cst_64 = arith.constant dense<0.000000e+00> : vector<64x224xf32>
    %51 = tpu.matmul %48, %50, %cst_64 {dimension_numbers = #tpu.dot_dimension_numbers<[1], [0], [0], [1], [0, 0, 1, 1], [], []>} : vector<64x16xf32>, vector<16x224xf32>, vector<64x224xf32> -> vector<64x224xf32>
    %52 = arith.addf %46, %51 : vector<64x224xf32>
    %c0_65 = arith.constant 0 : index
    %c0_66 = arith.constant 0 : index
    %53 = vector.load %arg5[%c0_65, %c0_66] : memref<64x224xf32, #tpu.memory_space<vmem>>, vector<64x224xf32>
    tpu.vector_store %arg5[%c0_65, %c0_66], %52 {strides = array<i32>} : memref<64x224xf32, #tpu.memory_space<vmem>>, vector<64x224xf32>,
    %c0_67 = arith.constant 0 : index
    %c0_68 = arith.constant 0 : index
    %54 = vector.load %arg3[%c0_67, %c0_68] : memref<64x56xf32, #tpu.memory_space<vmem>>, vector<64x56xf32>
    %c0_69 = arith.constant 0 : index
    %c0_70 = arith.constant 0 : index
    %55 = vector.load %arg4[%c0_69, %c0_70] : memref<56x56xf32, #tpu.memory_space<vmem>>, vector<56x56xf32>
    %cst_71 = arith.constant dense<0.000000e+00> : vector<64x56xf32>
    %56 = tpu.matmul %54, %55, %cst_71 {dimension_numbers = #tpu.dot_dimension_numbers<[1], [0], [0], [1], [0, 0, 1, 1], [], []>, precision = #tpu.contract_precision<fp32>} : vector<64x56xf32>, vector<56x56xf32>, vector<64x56xf32> -> vector<64x56xf32>
    %c0_72 = arith.constant 0 : index
    %c0_73 = arith.constant 0 : index
    %57 = vector.load %arg6[%c0_72, %c0_73] : memref<64x56xf32, #tpu.memory_space<vmem>>, vector<64x56xf32>
    tpu.vector_store %arg6[%c0_72, %c0_73], %56 {strides = array<i32>} : memref<64x56xf32, #tpu.memory_space<vmem>>, vector<64x56xf32>,
    return
  }
  func.func @transform_0(%arg0: i32) -> (i32, i32, i32) {
    %c0_i32 = arith.constant 0 : i32
    %c0_i32_0 = arith.constant 0 : i32
    %c0_i32_1 = arith.constant 0 : i32
    return %c0_i32, %arg0, %c0_i32_0 : i32, i32, i32
  }
  func.func @transform_1(%arg0: i32) -> (i32, i32, i32) {
    %c0_i32 = arith.constant 0 : i32
    %c0_i32_0 = arith.constant 0 : i32
    %c0_i32_1 = arith.constant 0 : i32
    %c0_i32_2 = arith.constant 0 : i32
    return %c0_i32, %c0_i32_0, %c0_i32_1 : i32, i32, i32
  }
  func.func @transform_2(%arg0: i32) -> (i32, i32) {
    %c0_i32 = arith.constant 0 : i32
    %c0_i32_0 = arith.constant 0 : i32
    return %arg0, %c0_i32 : i32, i32
  }
  func.func @transform_3(%arg0: i32) -> (i32, i32) {
    %c0_i32 = arith.constant 0 : i32
    %c0_i32_0 = arith.constant 0 : i32
    %c0_i32_1 = arith.constant 0 : i32
    return %c0_i32, %c0_i32_0 : i32, i32
  }
  func.func @transform_4(%arg0: i32) -> (i32, i32) {
    %c0_i32 = arith.constant 0 : i32
    %c0_i32_0 = arith.constant 0 : i32
    return %arg0, %c0_i32 : i32, i32
  }
  func.func @transform_5(%arg0: i32) -> (i32, i32) {
    %c0_i32 = arith.constant 0 : i32
    %c0_i32_0 = arith.constant 0 : i32
    return %arg0, %c0_i32 : i32, i32
  }
}

</mosaic_0001>

<bundles_post_ra>
// kernel: tpu_custom_call.1
= control target key start
LH: loop header
LB: loop body
LE: loop exit
PB: predicated region body
PF: predicated region fallthrough
CT: control target
= control target key end

     0   :  { %vm32_vm0 = vcmask 130048   ;;  %s2785_s0 = inlined_call_operand.vmem [shape: f32[7,64,16], index: 0, kind: input, shape index: {}]   ;;  %s2786_s1 = inlined_call_operand.vmem [shape: f32[7,16,224], index: 1, kind: input, shape index: {}]   ;;  %s2787_s2 = inlined_call_operand.vmem [shape: f32[64,56], index: 2, kind: input, shape index: {}]   ;;  %s2788_s3 = inlined_call_operand.vmem [shape: f32[56,56], index: 3, kind: input, shape index: {}]   ;;  %s2789_s4 = inlined_call_operand.hbm [shape: f32[64,224], index: 4, kind: output, shape index: {0}]   ;;  %s2790_s5 = inlined_call_operand.vmem [shape: f32[64,56], index: 5, kind: output, shape index: {1}]  }
   0x1   :  { %v30_v0 = vld [vmem:[%s2786_s1 + $0x10] sm:$0xff]  ;;  %v31_v1 = vld [vmem:[%s2786_s1 + $0x18] sm:$0xff]  ;;  %v28_v4 = vld [vmem:[%s2786_s1] sm:$0xff] }
   0x2   :  { %v1701_v2 = vld [vmem:[%s2786_s1 + $0x30] sm:$0xff]  ;;  %71 = vmatpush.msra.mxu0 %v30_v0  ;;  %112 = vmatpush.msra.mxu1 %v31_v1  ;;  %v1702_v3 = vld [vmem:[%s2786_s1 + $0x38] sm:$0xff]  ;;  %v29_v5 = vld [vmem:[%s2786_s1 + $0x8] sm:$0xff] }
   0x3   :  { %224 = vmatpush.msra.mxu2 %v1701_v2  ;;  %265 = vmatpush.msra.mxu3 %v1702_v3  ;;  %v1699_v6 = vld [vmem:[%s2786_s1 + $0x20] sm:$0xff]  ;;  %v1700_v7 = vld [vmem:[%s2786_s1 + $0x28] sm:$0xff]  ;;  %v1757_v10 = vld [vmem:[%s2786_s1 + $0x70] sm:$0xff] }
   0x4   :  { %v20_v8 = vld [vmem:[%s2785_s0] sm:$0xff]  ;;  %72 = vmatpush.msra.mxu0 %v28_v4  ;;  %113 = vmatpush.msra.mxu1 %v29_v5  ;;  %v1729_v11 = vld [vmem:[%s2786_s1 + $0x50] sm:$0xff]  ;;  %v1758_v12 = vld [vmem:[%s2786_s1 + $0x78] sm:$0xff] }
   0x5   :  { %v1691_v9 = vld [vmem:[%s2785_s0 + $0x40] sm:$0xff]  ;;  %225 = vmatpush.msra.mxu2 %v1699_v6  ;;  %266 = vmatpush.msra.mxu3 %v1700_v7  ;;  %v1730_v13 = vld [vmem:[%s2786_s1 + $0x58] sm:$0xff]  ;;  %v1756_v16 = vld [vmem:[%s2786_s1 + $0x68] sm:$0xff] }
   0x6   :  { %1675 = vmatmul.msk.f32.vlgmr.msra.gmra.mxu0 %vm32_vm0, %v20_v8  ;;  %1683 = vmatmul.msk.f32.vlgmr.msra.gmra.mxu1 %vm32_vm0, %v20_v8  ;;  %v1755_v14 = vld [vmem:[%s2786_s1 + $0x60] sm:$0xff]  ;;  %v1728_v17 = vld [vmem:[%s2786_s1 + $0x48] sm:$0xff] }
   0x7   :  { %1703 = vmatmul.msk.f32.vlgmr.msra.gmra.mxu2 %vm32_vm0, %v1691_v9  ;;  %1711 = vmatmul.msk.f32.vlgmr.msra.gmra.mxu3 %vm32_vm0, %v1691_v9  ;;  %v1727_v15 = vld [vmem:[%s2786_s1 + $0x40] sm:$0xff] }
   0x8   :  { %560 = vmatpush.msrb.mxu2 %v1757_v10  ;;  %392 = vmatpush.msrb.mxu0 %v1729_v11 }
   0x9   :  { %601 = vmatpush.msrb.mxu3 %v1758_v12  ;;  %433 = vmatpush.msrb.mxu1 %v1730_v13 }
   0xa   :  { %561 = vmatpush.msrb.mxu2 %v1755_v14  ;;  %393 = vmatpush.msrb.mxu0 %v1727_v15 }
   0xb   :  { %11 = vsyncpa [#allocation3], 0  ;;  %v21_v18 = vld [vmem:[%s2785_s0 + $0x8] sm:$0xff]  ;;  %602 = vmatpush.msrb.mxu3 %v1756_v16  ;;  %434 = vmatpush.msrb.mxu1 %v1728_v17  ;;  %v22_v20 = vld [vmem:[%s2785_s0 + $0x10] sm:$0xff]  ;;  %vm140_vm1 = vcmask 785408   ;;  %vm1179_vm2 = vcmask 457728  }
   0xc   :  { %v1692_v19 = vld [vmem:[%s2785_s0 + $0x48] sm:$0xff]  ;;  %v1693_v21 = vld [vmem:[%s2785_s0 + $0x50] sm:$0xff]  ;;  %v23_v22 = vld [vmem:[%s2785_s0 + $0x18] sm:$0xff]  ;;  %s1659_s13 = sshll.u32 %s2789_s4, 4  ;;  %s1889_s14 = smov 256   ;;  %s1660_s13 = int_to_ptr.hbm [resolvable:$true] %s1659_s13 }
   0xd   :  { %v1694_v23 = vld [vmem:[%s2785_s0 + $0x58] sm:$0xff]  ;;  %v24_v24 = vld [vmem:[%s2785_s0 + $0x20] sm:$0xff]  ;;  %v1813_v26 = vld [vmem:[%s2786_s1 + $0xb0] sm:$0xff]  ;;  %s1890_s15 = smov 16  }
   0xe   :  { %1676 = vmatmul.msk.f32.gmra.mxu0 %vm32_vm0, %v21_v18  ;;  %1684 = vmatmul.msk.f32.gmra.mxu1 %vm32_vm0, %v21_v18  ;;  %v1695_v25 = vld [vmem:[%s2785_s0 + $0x60] sm:$0xff]  ;;  %v1785_v27 = vld [vmem:[%s2786_s1 + $0x90] sm:$0xff]  ;;  %v1814_v28 = vld [vmem:[%s2786_s1 + $0xb8] sm:$0xff] }
   0xf   :  { %1704 = vmatmul.msk.f32.gmra.mxu2 %vm32_vm0, %v1692_v19  ;;  %1712 = vmatmul.msk.f32.gmra.mxu3 %vm32_vm0, %v1692_v19  ;;  %v1786_v29 = vld [vmem:[%s2786_s1 + $0x98] sm:$0xff]  ;;  %v25_v30 = vld [vmem:[%s2785_s0 + $0x28] sm:$0xff]  ;;  %v26_v32 = vld [vmem:[%s2785_s0 + $0x30] sm:$0xff] }
  0x10   :  { %896 = vmatpush.msra.mxu2 %v1813_v26  ;;  %728 = vmatpush.msra.mxu0 %v1785_v27  ;;  %v1696_v31 = vld [vmem:[%s2785_s0 + $0x68] sm:$0xff]  ;;  %v1697_v33 = vld [vmem:[%s2785_s0 + $0x70] sm:$0xff]  ;;  %v27_v34 = vld [vmem:[%s2785_s0 + $0x38] sm:$0xff] }
  0x11   :  { %937 = vmatpush.msra.mxu3 %v1814_v28  ;;  %769 = vmatpush.msra.mxu1 %v1786_v29  ;;  %v1698_v35 = vld [vmem:[%s2785_s0 + $0x78] sm:$0xff]  ;;  %v1719_v36 = vld [vmem:[%s2785_s0 + $0x80] sm:$0xff]  ;;  %v1812_v40 = vld [vmem:[%s2786_s1 + $0xa8] sm:$0xff] }
  0x12   :  { %v1747_v37 = vld [vmem:[%s2785_s0 + $0xc0] sm:$0xff]  ;;  %v1784_v41 = vld [vmem:[%s2786_s1 + $0x88] sm:$0xff]  ;;  %v1721_v44 = vld [vmem:[%s2785_s0 + $0x90] sm:$0xff] }
  0x13   :  { %v1811_v38 = vld [vmem:[%s2786_s1 + $0xa0] sm:$0xff]  ;;  %938 = vmatpush.msra.mxu3 %v1812_v40  ;;  %770 = vmatpush.msra.mxu1 %v1784_v41  ;;  %v1720_v42 = vld [vmem:[%s2785_s0 + $0x88] sm:$0xff]  ;;  %v1749_v45 = vld [vmem:[%s2785_s0 + $0xd0] sm:$0xff] }
  0x14   :  { %v1783_v39 = vld [vmem:[%s2786_s1 + $0x80] sm:$0xff]  ;;  %897 = vmatpush.msra.mxu2 %v1811_v38  ;;  %v1748_v43 = vld [vmem:[%s2785_s0 + $0xc8] sm:$0xff]  ;;  %v1722_v46 = vld [vmem:[%s2785_s0 + $0x98] sm:$0xff] }
  0x15   :  { %729 = vmatpush.msra.mxu0 %v1783_v39  ;;  %v1750_v47 = vld [vmem:[%s2785_s0 + $0xd8] sm:$0xff]  ;;  %v1723_v48 = vld [vmem:[%s2785_s0 + $0xa0] sm:$0xff]  ;;  %v1178_v50 = vld [vmem:[%s2788_s3 + $0x30] sm:$0xff] }
  0x16   :  { %1677 = vmatmul.msk.f32.gmra.mxu0 %vm32_vm0, %v22_v20  ;;  %1685 = vmatmul.msk.f32.gmra.mxu1 %vm32_vm0, %v22_v20  ;;  %v1751_v49 = vld [vmem:[%s2785_s0 + $0xe0] sm:$0xff]  ;;  %v1841_v51 = vld [vmem:[%s2786_s1 + $0xd0] sm:$0xff]  ;;  %v2129_v52 = vand.u32 4294901760, %v1178_v50  ;;  %v1724_v54 = vld [vmem:[%s2785_s0 + $0xa8] sm:$0xff] }
  0x17   :  { %1705 = vmatmul.msk.f32.gmra.mxu2 %vm32_vm0, %v1693_v21  ;;  %1713 = vmatmul.msk.f32.gmra.mxu3 %vm32_vm0, %v1693_v21  ;;  %v1752_v55 = vld [vmem:[%s2785_s0 + $0xe8] sm:$0xff]  ;;  %v1842_v58 = vld [vmem:[%s2786_s1 + $0xd8] sm:$0xff]  ;;  %v1725_v62 = vld [vmem:[%s2785_s0 + $0xb0] sm:$0xff] }
  0x18   :  { %v2133_v53 = vsub.f32 %v1178_v50, %v2129_v52  ;;  %v1177_v59 = vld [vmem:[%s2788_s3 + $0x28] sm:$0xff]  ;;  %v1753_v63 = vld [vmem:[%s2785_s0 + $0xf0] sm:$0xff]  ;;  %v1726_v3 = vld [vmem:[%s2785_s0 + $0xb8] sm:$0xff] }
  0x19   :  { %v2155_v61 = vand.u32 4294901760, %v1177_v59  ;;  %v1754_v4 = vld [vmem:[%s2785_s0 + $0xf8] sm:$0xff]  ;;  %v1176_v6 = vld [vmem:[%s2788_s3 + $0x20] sm:$0xff]  ;;  %v1776_v26 = vld [vmem:[%s2785_s0 + $0x108] sm:$0xff] }
  0x1a   :  { %v1303_v56 = vand.u32 4294901760, %v2133_v53  ;;  %v2188_v7 = vand.u32 4294901760, %v1176_v6  ;;  %v1775_v11 = vld [vmem:[%s2785_s0 + $0x100] sm:$0xff]  ;;  %v1175_v15 = vld [vmem:[%s2788_s3 + $0x18] sm:$0xff]  ;;  %v1804_v29 = vld [vmem:[%s2785_s0 + $0x148] sm:$0xff] }
  0x1b   :  { %v2167_v0 = vsub.f32 %v1177_v59, %v2155_v61  ;;  %v1803_v13 = vld [vmem:[%s2785_s0 + $0x140] sm:$0xff]  ;;  %v2212_v17 = vand.u32 4294901760, %v1175_v15 }
  0x1c   :  { %v1304_v57 = vsub.f32 %v2133_v53, %v1303_v56  ;;  %v2192_v8 = vsub.f32 %v1176_v6, %v2188_v7  ;;  %v1839_v18 = vld [vmem:[%s2786_s1 + $0xc0] sm:$0xff] }
  0x1d   :  { %v1309_v1 = vand.u32 4294901760, %v2167_v0  ;;  %v2219_v19 = vsub.f32 %v1175_v15, %v2212_v17 }
  0x1e   :  { %1678 = vmatmul.msk.f32.gmra.mxu0 %vm32_vm0, %v23_v22  ;;  %1686 = vmatmul.msk.f32.gmra.mxu1 %vm32_vm0, %v23_v22  ;;  %v1305_v60 = vand.u32 4294901760, %v1304_v57  ;;  %v1315_v12 = vand.u32 4294901760, %v2192_v8 }
  0x1f   :  { %1706 = vmatmul.msk.f32.gmra.mxu2 %vm32_vm0, %v1694_v23  ;;  %1714 = vmatmul.msk.f32.gmra.mxu3 %vm32_vm0, %v1694_v23  ;;  %v1310_v2 = vsub.f32 %v2167_v0, %v1309_v1  ;;  %v1321_v27 = vand.u32 4294901760, %v2219_v19 }
  0x20   :  { %v1316_v14 = vsub.f32 %v2192_v8, %v1315_v12 }
  0x21   :  { %v1311_v5 = vand.u32 4294901760, %v1310_v2 }
  0x22   :  { %v1317_v16 = vand.u32 4294901760, %v1316_v14 }
  0x26   :  { %1679 = vmatmul.msk.f32.gmra.mxu0 %vm32_vm0, %v24_v24  ;;  %1687 = vmatmul.msk.f32.gmra.mxu1 %vm32_vm0, %v24_v24 }
  0x27   :  { %1707 = vmatmul.msk.f32.gmra.mxu2 %vm32_vm0, %v1695_v25  ;;  %1715 = vmatmul.msk.f32.gmra.mxu3 %vm32_vm0, %v1695_v25 }
  0x2e   :  { %1680 = vmatmul.msk.f32.gmra.mxu0 %vm32_vm0, %v25_v30  ;;  %1688 = vmatmul.msk.f32.gmra.mxu1 %vm32_vm0, %v25_v30  ;;  %v1322_v30 = vsub.f32 %v2219_v19, %v1321_v27 }
  0x2f   :  { %1708 = vmatmul.msk.f32.gmra.mxu2 %vm32_vm0, %v1696_v31  ;;  %1716 = vmatmul.msk.f32.gmra.mxu3 %vm32_vm0, %v1696_v31  ;;  %v1840_v31 = vld [vmem:[%s2786_s1 + $0xc8] sm:$0xff] }
  0x36   :  { %1681 = vmatmul.msk.f32.gmra.mxu0 %vm32_vm0, %v26_v32  ;;  %1689 = vmatmul.msk.f32.gmra.mxu1 %vm32_vm0, %v26_v32  ;;  %v1174_v32 = vld [vmem:[%s2788_s3 + $0x10] sm:$0xff] }
  0x37   :  { %1709 = vmatmul.msk.f32.gmra.mxu2 %vm32_vm0, %v1697_v33  ;;  %1717 = vmatmul.msk.f32.gmra.mxu3 %vm32_vm0, %v1697_v33  ;;  %v1323_v33 = vand.u32 4294901760, %v1322_v30 }
  0x3e   :  { %1682 = vmatmul.msk.f32.gmra.mxu0 %vm32_vm0, %v27_v34  ;;  %1690 = vmatmul.msk.f32.gmra.mxu1 %vm32_vm0, %v27_v34  ;;  %v2247_v34 = vand.u32 4294901760, %v1174_v32 }
  0x3f   :  { %1710 = vmatmul.msk.f32.gmra.mxu2 %vm32_vm0, %v1698_v35  ;;  %1718 = vmatmul.msk.f32.gmra.mxu3 %vm32_vm0, %v1698_v35 }
  0x40   :  { %v2252_v35 = vsub.f32 %v1174_v32, %v2247_v34 }
  0x46   :  { %1731 = vmatmul.msk.f32.vlgmr.msrb.gmra.mxu0 %vm32_vm0, %v1719_v36  ;;  %1739 = vmatmul.msk.f32.vlgmr.msrb.gmra.mxu1 %vm32_vm0, %v1719_v36 }
  0x47   :  { %1759 = vmatmul.msk.f32.vlgmr.msrb.gmra.mxu2 %vm32_vm0, %v1747_v37  ;;  %1767 = vmatmul.msk.f32.vlgmr.msrb.gmra.mxu3 %vm32_vm0, %v1747_v37 }
  0x48   :  { %1064 = vmatpush.msrb.mxu0 %v1841_v51  ;;  %1214 = vmatpush.msrb.mxu2 %v2129_v52 }
  0x49   :  { %1105 = vmatpush.msrb.mxu1 %v1842_v58  ;;  %1306 = vmatpush.msrb.mxu3 %v1305_v60  ;;  %v1778_v60 = vld [vmem:[%s2785_s0 + $0x118] sm:$0xff] }
  0x4a   :  { %1216 = vmatpush.msrb.mxu2 %v2155_v61  ;;  %1065 = vmatpush.msrb.mxu0 %v1839_v18 }
  0x4b   :  { %1312 = vmatpush.msrb.mxu3 %v1311_v5  ;;  %1106 = vmatpush.msrb.mxu1 %v1840_v31 }
  0x4c   :  { %1218 = vmatpush.msrb.mxu2 %v2188_v7 }
  0x4d   :  { %1318 = vmatpush.msrb.mxu3 %v1317_v16 }
  0x4e   :  { %1732 = vmatmul.msk.f32.gmra.mxu0 %vm32_vm0, %v1720_v42  ;;  %1740 = vmatmul.msk.f32.gmra.mxu1 %vm32_vm0, %v1720_v42  ;;  %v1777_v42 = vld [vmem:[%s2785_s0 + $0x110] sm:$0xff] }
  0x4f   :  { %1760 = vmatmul.msk.f32.gmra.mxu2 %vm32_vm0, %v1748_v43  ;;  %1768 = vmatmul.msk.f32.gmra.mxu3 %vm32_vm0, %v1748_v43  ;;  %v1327_v43 = vand.u32 4294901760, %v2252_v35 }
  0x50   :  { %1220 = vmatpush.msrb.mxu2 %v2212_v17  ;;  %1324 = vmatpush.msrb.mxu3 %v1323_v33  ;;  %v1781_v33 = vld [vmem:[%s2785_s0 + $0x130] sm:$0xff] }
  0x52   :  { %1222 = vmatpush.msrb.mxu2 %v2247_v34 }
  0x56   :  { %1733 = vmatmul.msk.f32.gmra.mxu0 %vm32_vm0, %v1721_v44  ;;  %1741 = vmatmul.msk.f32.gmra.mxu1 %vm32_vm0, %v1721_v44 }
  0x57   :  { %1761 = vmatmul.msk.f32.gmra.mxu2 %vm32_vm0, %v1749_v45  ;;  %1769 = vmatmul.msk.f32.gmra.mxu3 %vm32_vm0, %v1749_v45  ;;  %v1805_v45 = vld [vmem:[%s2785_s0 + $0x150] sm:$0xff] }
  0x5e   :  { %1734 = vmatmul.msk.f32.gmra.mxu0 %vm32_vm0, %v1722_v46  ;;  %1742 = vmatmul.msk.f32.gmra.mxu1 %vm32_vm0, %v1722_v46  ;;  %v1328_v46 = vsub.f32 %v2252_v35, %v1327_v43 }
  0x5f   :  { %1762 = vmatmul.msk.f32.gmra.mxu2 %vm32_vm0, %v1750_v47  ;;  %1770 = vmatmul.msk.f32.gmra.mxu3 %vm32_vm0, %v1750_v47  ;;  %v1173_v47 = vld [vmem:[%s2788_s3 + $0x8] sm:$0xff] }
  0x66   :  { %1735 = vmatmul.msk.f32.gmra.mxu0 %vm32_vm0, %v1723_v48  ;;  %1743 = vmatmul.msk.f32.gmra.mxu1 %vm32_vm0, %v1723_v48  ;;  %v1329_v48 = vand.u32 4294901760, %v1328_v46  ;;  %v1782_v46 = vld [vmem:[%s2785_s0 + $0x138] sm:$0xff] }
  0x67   :  { %1763 = vmatmul.msk.f32.gmra.mxu2 %vm32_vm0, %v1751_v49  ;;  %1771 = vmatmul.msk.f32.gmra.mxu3 %vm32_vm0, %v1751_v49  ;;  %v2279_v49 = vand.u32 4294901760, %v1173_v47 }
  0x68   :  { %1330 = vmatpush.msrb.mxu3 %v1329_v48 }
  0x69   :  { %1224 = vmatpush.msrb.mxu2 %v2279_v49  ;;  %v2284_v50 = vsub.f32 %v1173_v47, %v2279_v49 }
  0x6e   :  { %1736 = vmatmul.msk.f32.gmra.mxu0 %vm32_vm0, %v1724_v54  ;;  %1744 = vmatmul.msk.f32.gmra.mxu1 %vm32_vm0, %v1724_v54 }
  0x6f   :  { %1764 = vmatmul.msk.f32.gmra.mxu2 %vm32_vm0, %v1752_v55  ;;  %1772 = vmatmul.msk.f32.gmra.mxu3 %vm32_vm0, %v1752_v55 }
  0x76   :  { %1737 = vmatmul.msk.f32.gmra.mxu0 %vm32_vm0, %v1725_v62  ;;  %1745 = vmatmul.msk.f32.gmra.mxu1 %vm32_vm0, %v1725_v62  ;;  %v1333_v62 = vand.u32 4294901760, %v2284_v50 }
  0x77   :  { %1765 = vmatmul.msk.f32.gmra.mxu2 %vm32_vm0, %v1753_v63  ;;  %1773 = vmatmul.msk.f32.gmra.mxu3 %vm32_vm0, %v1753_v63  ;;  %v1172_v63 = vld [vmem:[%s2788_s3] sm:$0xff] }
  0x78   :  { %v1334_v5 = vsub.f32 %v2284_v50, %v1333_v62 }
  0x7e   :  { %1738 = vmatmul.msk.f32.gmra.mxu0 %vm32_vm0, %v1726_v3  ;;  %1746 = vmatmul.msk.f32.gmra.mxu1 %vm32_vm0, %v1726_v3  ;;  %v1806_v3 = vld [vmem:[%s2785_s0 + $0x158] sm:$0xff] }
  0x7f   :  { %1766 = vmatmul.msk.f32.gmra.mxu2 %vm32_vm0, %v1754_v4  ;;  %1774 = vmatmul.msk.f32.gmra.mxu3 %vm32_vm0, %v1754_v4  ;;  %v2301_v4 = vand.u32 4294901760, %v1172_v63 }
  0x81   :  { %v1338_v6 = vsub.f32 %v1172_v63, %v2301_v4  ;;  %1226 = vmatpush.msrb.mxu2 %v2301_v4 }
  0x83   :  { %v74_v9 = vpop.f32.mrf.mxu0  ;;  %v115_v10 = vpop.f32.mrf.mxu1 }
  0x84   :  { %141 = vst.msk [vmem:[#allocation2 + $0x8] sm:$0xff] %vm140_vm1, %v115_v10  ;;  %v1339_v10 = vand.u32 4294901760, %v1338_v6 }
  0x86   :  { %1787 = vmatmul.msk.f32.vlgmr.msra.gmra.mxu0 %vm32_vm0, %v1775_v11  ;;  %1795 = vmatmul.msk.f32.vlgmr.msra.gmra.mxu1 %vm32_vm0, %v1775_v11  ;;  %v1340_v14 = vsub.f32 %v1338_v6, %v1339_v10 }
  0x87   :  { %1815 = vmatmul.msk.f32.vlgmr.msra.gmra.mxu2 %vm32_vm0, %v1803_v13  ;;  %1823 = vmatmul.msk.f32.vlgmr.msra.gmra.mxu3 %vm32_vm0, %v1803_v13 }
  0x88   :  { %1387 = vmatpush.msra.mxu0 %v2133_v53  ;;  %1457 = vmatpush.msra.mxu1 %v2129_v52 }
  0x89   :  { %1531 = vmatpush.msra.mxu2 %v1303_v56  ;;  %v1807_v56 = vld [vmem:[%s2785_s0 + $0x160] sm:$0xff] }
  0x8a   :  { %v227_v20 = vpop.f32.mrf.mxu2  ;;  %v268_v21 = vpop.f32.mrf.mxu3  ;;  %1390 = vmatpush.msra.mxu0 %v2167_v0  ;;  %1459 = vmatpush.msra.mxu1 %v2155_v61 }
  0x8b   :  { %v2222_v22 = vadd.f32 %v227_v20, %v74_v9  ;;  %v157_v23 = vld [vmem:[#allocation2 + $0x8] sm:$0xff]  ;;  %v77_v24 = vpop.f32.mrf.mxu0  ;;  %v118_v25 = vpop.f32.mrf.mxu1  ;;  %v1335_v9 = vand.u32 4294901760, %v1334_v5  ;;  %1535 = vmatpush.msra.mxu2 %v1309_v1  ;;  %v1831_v5 = vld [vmem:[%s2785_s0 + $0x180] sm:$0xff] }
  0x8c   :  { %v293_v28 = vadd.f32 %v268_v21, %v157_v23  ;;  %143 = vst.msk [vmem:[#allocation2 + $0x18] sm:$0xff] %vm140_vm1, %v118_v25  ;;  %1393 = vmatpush.msra.mxu0 %v2192_v8  ;;  %1461 = vmatpush.msra.mxu1 %v2188_v7  ;;  %v1779_v21 = vld [vmem:[%s2785_s0 + $0x120] sm:$0xff]  ;;  %v1341_v23 = vand.u32 4294901760, %v1340_v14  ;;  %v1167_v14 = vld [vmem:[%s2787_s2 + $0x18] sm:$0xff] }
  0x8d   :  { %1336 = vmatpush.msrb.mxu3 %v1335_v9  ;;  %1539 = vmatpush.msra.mxu2 %v1315_v12 }
  0x8e   :  { %309 = vst.msk [vmem:[#allocation2 + $0x8] sm:$0xff] %vm140_vm1, %v293_v28  ;;  %1788 = vmatmul.msk.f32.gmra.mxu0 %vm32_vm0, %v1776_v26  ;;  %1796 = vmatmul.msk.f32.gmra.mxu1 %vm32_vm0, %v1776_v26  ;;  %v1780_v26 = vld [vmem:[%s2785_s0 + $0x128] sm:$0xff] }
  0x8f   :  { %1816 = vmatmul.msk.f32.gmra.mxu2 %vm32_vm0, %v1804_v29  ;;  %1824 = vmatmul.msk.f32.gmra.mxu3 %vm32_vm0, %v1804_v29 }
  0x90   :  { %1396 = vmatpush.msra.mxu0 %v2219_v19  ;;  %1463 = vmatpush.msra.mxu1 %v2212_v17 }
  0x91   :  { %1342 = vmatpush.msrb.mxu3 %v1341_v23  ;;  %1543 = vmatpush.msra.mxu2 %v1321_v27  ;;  %v1164_v27 = vld [vmem:[%s2787_s2] sm:$0xff] }
  0x92   :  { %v230_v36 = vpop.f32.mrf.mxu2  ;;  %v271_v37 = vpop.f32.mrf.mxu3  ;;  %1399 = vmatpush.msra.mxu0 %v2252_v35  ;;  %1465 = vmatpush.msra.mxu1 %v2247_v34 }
  0x93   :  { %v2256_v38 = vadd.f32 %v230_v36, %v77_v24  ;;  %v159_v39 = vld [vmem:[#allocation2 + $0x18] sm:$0xff]  ;;  %v80_v40 = vpop.f32.mrf.mxu0  ;;  %v121_v41 = vpop.f32.mrf.mxu1  ;;  %1599 = vmatpush.msra.mxu3 %v2129_v52  ;;  %1547 = vmatpush.msra.mxu2 %v1327_v43  ;;  %v1808_v52 = vld [vmem:[%s2785_s0 + $0x168] sm:$0xff] }
  0x94   :  { %v295_v44 = vadd.f32 %v271_v37, %v159_v39  ;;  %145 = vst.msk [vmem:[#allocation2 + $0x28] sm:$0xff] %vm140_vm1, %v121_v41  ;;  %1402 = vmatpush.msra.mxu0 %v2284_v50  ;;  %1467 = vmatpush.msra.mxu1 %v2279_v49  ;;  %v1810_v50 = vld [vmem:[%s2785_s0 + $0x178] sm:$0xff] }
  0x95   :  { %1601 = vmatpush.msra.mxu3 %v2155_v61  ;;  %1551 = vmatpush.msra.mxu2 %v1333_v62  ;;  %v1181_v61 = vsel %vm1179_vm2, %v1164_v27, 0 }
  0x96   :  { %311 = vst.msk [vmem:[#allocation2 + $0x18] sm:$0xff] %vm140_vm1, %v295_v44  ;;  %1789 = vmatmul.msk.f32.gmra.mxu0 %vm32_vm0, %v1777_v42  ;;  %1797 = vmatmul.msk.f32.gmra.mxu1 %vm32_vm0, %v1777_v42  ;;  %v2366_v35 = vand.u32 4294901760, %v1181_v61 }
  0x97   :  { %1817 = vmatmul.msk.f32.gmra.mxu2 %vm32_vm0, %v1805_v45  ;;  %1825 = vmatmul.msk.f32.gmra.mxu3 %vm32_vm0, %v1805_v45 }
  0x98   :  { %1405 = vmatpush.msra.mxu0 %v1338_v6  ;;  %1469 = vmatpush.msra.mxu1 %v2301_v4  ;;  %v2382_v37 = vsub.f32 %v1181_v61, %v2366_v35 }
  0x99   :  { %1603 = vmatpush.msra.mxu3 %v2188_v7  ;;  %1555 = vmatpush.msra.mxu2 %v1339_v10 }
  0x9a   :  { %v233_v51 = vpop.f32.mrf.mxu2  ;;  %v274_v54 = vpop.f32.mrf.mxu3  ;;  %v1229_v47 = vand.u32 4294901760, %v2382_v37 }
  0x9b   :  { %v2287_v55 = vadd.f32 %v233_v51, %v80_v40  ;;  %v161_v57 = vld [vmem:[#allocation2 + $0x28] sm:$0xff]  ;;  %v83_v58 = vpop.f32.mrf.mxu0  ;;  %v124_v59 = vpop.f32.mrf.mxu1  ;;  %1605 = vmatpush.msra.mxu3 %v2212_v17  ;;  %v1809_v17 = vld [vmem:[%s2785_s0 + $0x170] sm:$0xff] }
  0x9c   :  { %v297_v2 = vadd.f32 %v274_v54, %v161_v57  ;;  %147 = vst.msk [vmem:[#allocation2 + $0x38] sm:$0xff] %vm140_vm1, %v124_v59  ;;  %v1166_v51 = vld [vmem:[%s2787_s2 + $0x10] sm:$0xff]  ;;  %v1230_v54 = vsub.f32 %v2382_v37, %v1229_v47 }
  0x9d   :  { %1607 = vmatpush.msra.mxu3 %v2247_v34  ;;  %v1165_v34 = vld [vmem:[%s2787_s2 + $0x8] sm:$0xff] }
  0x9e   :  { %313 = vst.msk [vmem:[#allocation2 + $0x28] sm:$0xff] %vm140_vm1, %v297_v2  ;;  %1790 = vmatmul.msk.f32.gmra.mxu0 %vm32_vm0, %v1778_v60  ;;  %1798 = vmatmul.msk.f32.gmra.mxu1 %vm32_vm0, %v1778_v60  ;;  %v1184_v39 = vsel %vm1179_vm2, %v1165_v34, 0  ;;  %v1231_v6 = vand.u32 4294901760, %v1230_v54 }
  0x9f   :  { %1818 = vmatmul.msk.f32.gmra.mxu2 %vm32_vm0, %v1806_v3  ;;  %1826 = vmatmul.msk.f32.gmra.mxu3 %vm32_vm0, %v1806_v3  ;;  %v2392_v48 = vand.u32 4294901760, %v1184_v39  ;;  %v325_v3 = vld [vmem:[#allocation2 + $0x8] sm:$0xff] }
  0xa0   :  { %1609 = vmatpush.msra.mxu3 %v2279_v49 }
  0xa1   :  { %v2410_v57 = vsub.f32 %v1184_v39, %v2392_v48 }
  0xa2   :  { %v236_v11 = vpop.f32.mrf.mxu2  ;;  %v277_v13 = vpop.f32.mrf.mxu3  ;;  %1611 = vmatpush.msra.mxu3 %v2301_v4 }
  0xa3   :  { %v2316_v15 = vadd.f32 %v236_v11, %v83_v58  ;;  %v163_v16 = vld [vmem:[#allocation2 + $0x38] sm:$0xff]  ;;  %v86_v18 = vpop.f32.mrf.mxu0  ;;  %v127_v20 = vpop.f32.mrf.mxu1  ;;  %v1187_v58 = vsel %vm1179_vm2, %v1166_v51, 0  ;;  %v1237_v9 = vand.u32 4294901760, %v2410_v57 }
  0xa4   :  { %v299_v53 = vadd.f32 %v277_v13, %v163_v16  ;;  %149 = vst.msk [vmem:[#allocation2 + $0x48] sm:$0xff] %vm140_vm1, %v127_v20  ;;  %v2419_v10 = vand.u32 4294901760, %v1187_v58  ;;  %v1190_v20 = vsel %vm1179_vm2, %v1167_v14, 0 }
  0xa5   :  { %v1238_v16 = vsub.f32 %v2410_v57, %v1237_v9  ;;  %v329_v34 = vld [vmem:[#allocation2 + $0x28] sm:$0xff] }
  0xa6   :  { %315 = vst.msk [vmem:[#allocation2 + $0x38] sm:$0xff] %vm140_vm1, %v299_v53  ;;  %1791 = vmatmul.msk.f32.gmra.mxu0 %vm32_vm0, %v1779_v21  ;;  %1799 = vmatmul.msk.f32.gmra.mxu1 %vm32_vm0, %v1779_v21 }
  0xa7   :  { %1819 = vmatmul.msk.f32.gmra.mxu2 %vm32_vm0, %v1807_v56  ;;  %1827 = vmatmul.msk.f32.gmra.mxu3 %vm32_vm0, %v1807_v56 }
  0xaa   :  { %v239_v0 = vpop.f32.mrf.mxu2  ;;  %v280_v1 = vpop.f32.mrf.mxu3 }
  0xab   :  { %v2339_v8 = vadd.f32 %v239_v0, %v86_v18  ;;  %v165_v12 = vld [vmem:[#allocation2 + $0x48] sm:$0xff]  ;;  %v89_v24 = vpop.f32.mrf.mxu0  ;;  %v130_v25 = vpop.f32.mrf.mxu1  ;;  %v2433_v18 = vsub.f32 %v1187_v58, %v2419_v10 }
  0xac   :  { %v301_v19 = vadd.f32 %v280_v1, %v165_v12  ;;  %151 = vst.msk [vmem:[#allocation2 + $0x58] sm:$0xff] %vm140_vm1, %v130_v25  ;;  %v327_v1 = vld [vmem:[#allocation2 + $0x18] sm:$0xff]  ;;  %v1239_v25 = vand.u32 4294901760, %v1238_v16 }
  0xae   :  { %317 = vst.msk [vmem:[#allocation2 + $0x48] sm:$0xff] %vm140_vm1, %v301_v19  ;;  %1792 = vmatmul.msk.f32.gmra.mxu0 %vm32_vm0, %v1780_v26  ;;  %1800 = vmatmul.msk.f32.gmra.mxu1 %vm32_vm0, %v1780_v26  ;;  %v1245_v26 = vand.u32 4294901760, %v2433_v18  ;;  %v2443_v19 = vand.u32 4294901760, %v1190_v20 }
  0xaf   :  { %1820 = vmatmul.msk.f32.gmra.mxu2 %vm32_vm0, %v1808_v52  ;;  %1828 = vmatmul.msk.f32.gmra.mxu3 %vm32_vm0, %v1808_v52 }
  0xb2   :  { %v242_v28 = vpop.f32.mrf.mxu2  ;;  %v283_v29 = vpop.f32.mrf.mxu3 }
  0xb3   :  { %v2361_v7 = vadd.f32 %v242_v28, %v89_v24  ;;  %v167_v30 = vld [vmem:[#allocation2 + $0x58] sm:$0xff]  ;;  %v92_v31 = vpop.f32.mrf.mxu0  ;;  %v133_v32 = vpop.f32.mrf.mxu1  ;;  %v1832_v24 = vld [vmem:[%s2785_s0 + $0x188] sm:$0xff]  ;;  %v1246_v28 = vsub.f32 %v2433_v18, %v1245_v26 }
  0xb4   :  { %v303_v36 = vadd.f32 %v283_v29, %v167_v30  ;;  %153 = vst.msk [vmem:[#allocation2 + $0x68] sm:$0xff] %vm140_vm1, %v133_v32  ;;  %v2456_v29 = vsub.f32 %v1190_v20, %v2443_v19 }
  0xb6   :  { %319 = vst.msk [vmem:[#allocation2 + $0x58] sm:$0xff] %vm140_vm1, %v303_v36  ;;  %1793 = vmatmul.msk.f32.gmra.mxu0 %vm32_vm0, %v1781_v33  ;;  %1801 = vmatmul.msk.f32.gmra.mxu1 %vm32_vm0, %v1781_v33 }
  0xb7   :  { %1821 = vmatmul.msk.f32.gmra.mxu2 %vm32_vm0, %v1809_v17  ;;  %1829 = vmatmul.msk.f32.gmra.mxu3 %vm32_vm0, %v1809_v17 }
  0xba   :  { %v245_v40 = vpop.f32.mrf.mxu2  ;;  %v286_v41 = vpop.f32.mrf.mxu3 }
  0xbb   :  { %v2386_v42 = vadd.f32 %v245_v40, %v92_v31  ;;  %v169_v43 = vld [vmem:[#allocation2 + $0x68] sm:$0xff]  ;;  %v95_v44 = vpop.f32.mrf.mxu0  ;;  %v136_v45 = vpop.f32.mrf.mxu1  ;;  %v1833_v40 = vld [vmem:[%s2785_s0 + $0x190] sm:$0xff] }
  0xbc   :  { %v305_v49 = vadd.f32 %v286_v41, %v169_v43  ;;  %155 = vst.msk [vmem:[#allocation2 + $0x78] sm:$0xff] %vm140_vm1, %v136_v45  ;;  %v1247_v41 = vand.u32 4294901760, %v1246_v28  ;;  %v1253_v43 = vand.u32 4294901760, %v2456_v29 }
  0xbe   :  { %321 = vst.msk [vmem:[#allocation2 + $0x68] sm:$0xff] %vm140_vm1, %v305_v49  ;;  %1794 = vmatmul.msk.f32.gmra.mxu0 %vm32_vm0, %v1782_v46  ;;  %1802 = vmatmul.msk.f32.gmra.mxu1 %vm32_vm0, %v1782_v46 }
  0xbf   :  { %1822 = vmatmul.msk.f32.gmra.mxu2 %vm32_vm0, %v1810_v50  ;;  %1830 = vmatmul.msk.f32.gmra.mxu3 %vm32_vm0, %v1810_v50  ;;  %v1254_v50 = vsub.f32 %v2456_v29, %v1253_v43 }
  0xc2   :  { %v248_v59 = vpop.f32.mrf.mxu2  ;;  %v289_v60 = vpop.f32.mrf.mxu3 }
  0xc3   :  { %v2413_v62 = vadd.f32 %v248_v59, %v95_v44  ;;  %v171_v63 = vld [vmem:[#allocation2 + $0x78] sm:$0xff]  ;;  %v395_v2 = vpop.f32.mrf.mxu0  ;;  %v436_v4 = vpop.f32.mrf.mxu1 }
  0xc4   :  { %v307_v11 = vadd.f32 %v289_v60, %v171_v63  ;;  %v461_v13 = vadd.f32 %v436_v4, %v325_v3  ;;  %v460_v21 = vadd.f32 %v395_v2, %v2222_v22  ;;  %v1168_v22 = vld [vmem:[%s2787_s2 + $0x20] sm:$0xff]  ;;  %v331_v3 = vld [vmem:[#allocation2 + $0x38] sm:$0xff] }
  0xc5   :  { %v1193_v30 = vsel %vm1179_vm2, %v1168_v22, 0 }
  0xc6   :  { %323 = vst.msk [vmem:[#allocation2 + $0x78] sm:$0xff] %vm140_vm1, %v307_v11  ;;  %1843 = vmatmul.msk.f32.vlgmr.msrb.gmra.mxu0 %vm32_vm0, %v1831_v5  ;;  %1851 = vmatmul.msk.f32.vlgmr.msrb.gmra.mxu1 %vm32_vm0, %v1831_v5  ;;  %v2467_v44 = vand.u32 4294901760, %v1193_v30  ;;  %v1834_v5 = vld [vmem:[%s2785_s0 + $0x198] sm:$0xff] }
  0xc7   :  { %477 = vst.msk [vmem:[#allocation2 + $0x8] sm:$0xff] %vm140_vm1, %v461_v13  ;;  %1232 = vmatmul.f32.vlgmr.msrb.gmra.mxu2 %v1231_v6  ;;  %1344 = vmatmul.f32.vlgmr.msrb.gmra.mxu3 %v2366_v35  ;;  %v1255_v6 = vand.u32 4294901760, %v1254_v50 }
  0xc8   :  { %v2480_v51 = vsub.f32 %v1193_v30, %v2467_v44 }
  0xca   :  { %v563_v53 = vpop.f32.mrf.mxu2  ;;  %v604_v56 = vpop.f32.mrf.mxu3  ;;  %v1261_v11 = vand.u32 4294901760, %v2480_v51 }
  0xcb   :  { %v2437_v23 = vadd.f32 %v563_v53, %v460_v21  ;;  %v398_v0 = vpop.f32.mrf.mxu0  ;;  %v439_v12 = vpop.f32.mrf.mxu1 }
  0xcc   :  { %v463_v52 = vadd.f32 %v439_v12, %v327_v1  ;;  %v462_v31 = vadd.f32 %v398_v0, %v2256_v38  ;;  %v1169_v38 = vld [vmem:[%s2787_s2 + $0x28] sm:$0xff]  ;;  %v1262_v21 = vsub.f32 %v2480_v51, %v1261_v11 }
  0xcd   :  { %v1196_v54 = vsel %vm1179_vm2, %v1169_v38, 0 }
  0xce   :  { %v493_v27 = vld [vmem:[#allocation2 + $0x8] sm:$0xff]  ;;  %479 = vst.msk [vmem:[#allocation2 + $0x18] sm:$0xff] %vm140_vm1, %v463_v52  ;;  %1844 = vmatmul.msk.f32.gmra.mxu0 %vm32_vm0, %v1832_v24  ;;  %1852 = vmatmul.msk.f32.gmra.mxu1 %vm32_vm0, %v1832_v24  ;;  %v2491_v13 = vand.u32 4294901760, %v1196_v54 }
  0xcf   :  { %v629_v61 = vadd.f32 %v604_v56, %v493_v27  ;;  %1240 = vmatmul.f32.gmra.mxu2 %v1239_v25  ;;  %1348 = vmatmul.f32.gmra.mxu3 %v2392_v48  ;;  %v333_v52 = vld [vmem:[#allocation2 + $0x48] sm:$0xff]  ;;  %v1835_v27 = vld [vmem:[%s2785_s0 + $0x1a0] sm:$0xff] }
  0xd0   :  { %v2504_v53 = vsub.f32 %v1196_v54, %v2491_v13  ;;  %v1836_v54 = vld [vmem:[%s2785_s0 + $0x1a8] sm:$0xff] }
  0xd1   :  { %645 = vst.msk [vmem:[#allocation2 + $0x8] sm:$0xff] %vm140_vm1, %v629_v61  ;;  %v1263_v61 = vand.u32 4294901760, %v1262_v21  ;;  %v337_v21 = vld [vmem:[#allocation2 + $0x68] sm:$0xff] }
  0xd2   :  { %v566_v32 = vpop.f32.mrf.mxu2  ;;  %v607_v33 = vpop.f32.mrf.mxu3  ;;  %v1269_v28 = vand.u32 4294901760, %v2504_v53 }
  0xd3   :  { %v2461_v36 = vadd.f32 %v566_v32, %v462_v31  ;;  %v401_v17 = vpop.f32.mrf.mxu0  ;;  %v442_v39 = vpop.f32.mrf.mxu1 }
  0xd4   :  { %v465_v45 = vadd.f32 %v442_v39, %v329_v34  ;;  %v464_v58 = vadd.f32 %v401_v17, %v2287_v55  ;;  %v1170_v55 = vld [vmem:[%s2787_s2 + $0x30] sm:$0xff]  ;;  %v1270_v17 = vsub.f32 %v2504_v53, %v1269_v28 }
  0xd5   :  { %v495_v46 = vld [vmem:[#allocation2 + $0x18] sm:$0xff]  ;;  %v1199_v56 = vsel %vm1179_vm2, %v1170_v55, 0 }
  0xd6   :  { %v631_v49 = vadd.f32 %v607_v33, %v495_v46  ;;  %481 = vst.msk [vmem:[#allocation2 + $0x28] sm:$0xff] %vm140_vm1, %v465_v45  ;;  %1845 = vmatmul.msk.f32.gmra.mxu0 %vm32_vm0, %v1833_v40  ;;  %1853 = vmatmul.msk.f32.gmra.mxu1 %vm32_vm0, %v1833_v40  ;;  %v2515_v30 = vand.u32 4294901760, %v1199_v56 }
  0xd7   :  { %1248 = vmatmul.f32.gmra.mxu2 %v1247_v41  ;;  %1352 = vmatmul.f32.gmra.mxu3 %v2419_v10 }
  0xd8   :  { %647 = vst.msk [vmem:[#allocation2 + $0x18] sm:$0xff] %vm140_vm1, %v631_v49  ;;  %v2528_v34 = vsub.f32 %v1199_v56, %v2515_v30  ;;  %v335_v49 = vld [vmem:[#allocation2 + $0x58] sm:$0xff] }
  0xda   :  { %v569_v59 = vpop.f32.mrf.mxu2  ;;  %v610_v60 = vpop.f32.mrf.mxu3 }
  0xdb   :  { %v2485_v63 = vadd.f32 %v569_v59, %v464_v58  ;;  %v404_v2 = vpop.f32.mrf.mxu0  ;;  %v445_v4 = vpop.f32.mrf.mxu1  ;;  %v1271_v58 = vand.u32 4294901760, %v1270_v17  ;;  %v1277_v59 = vand.u32 4294901760, %v2528_v34 }
  0xdc   :  { %v467_v14 = vadd.f32 %v445_v4, %v331_v3  ;;  %v466_v0 = vadd.f32 %v404_v2, %v2316_v15  ;;  %v1171_v15 = vld [vmem:[%s2787_s2 + $0x38] sm:$0xff] }
  0xdd   :  { %v497_v16 = vld [vmem:[#allocation2 + $0x28] sm:$0xff]  ;;  %v1202_v39 = vsel %vm1179_vm2, %v1171_v15, 0 }
  0xde   :  { %v633_v20 = vadd.f32 %v610_v60, %v497_v16  ;;  %483 = vst.msk [vmem:[#allocation2 + $0x38] sm:$0xff] %vm140_vm1, %v467_v14  ;;  %1846 = vmatmul.msk.f32.gmra.mxu0 %vm32_vm0, %v1834_v5  ;;  %1854 = vmatmul.msk.f32.gmra.mxu1 %vm32_vm0, %v1834_v5  ;;  %v2539_v60 = vand.u32 4294901760, %v1202_v39 }
  0xdf   :  { %1256 = vmatmul.f32.gmra.mxu2 %v1255_v6  ;;  %1356 = vmatmul.f32.gmra.mxu3 %v2443_v19 }
  0xe0   :  { %649 = vst.msk [vmem:[#allocation2 + $0x28] sm:$0xff] %vm140_vm1, %v633_v20  ;;  %v2549_v5 = vsub.f32 %v1202_v39, %v2539_v60  ;;  %v1838_v39 = vld [vmem:[%s2785_s0 + $0x1b8] sm:$0xff] }
  0xe2   :  { %v572_v1 = vpop.f32.mrf.mxu2  ;;  %v613_v12 = vpop.f32.mrf.mxu3 }
  0xe3   :  { %v2509_v24 = vadd.f32 %v572_v1, %v466_v0  ;;  %v407_v25 = vpop.f32.mrf.mxu0  ;;  %v448_v22 = vpop.f32.mrf.mxu1  ;;  %v1837_v0 = vld [vmem:[%s2785_s0 + $0x1b0] sm:$0xff]  ;;  %s1888_s0 = smov [#allocation2]  }
  0xe4   :  { %v469_v31 = vadd.f32 %v448_v22, %v333_v52  ;;  %v468_v40 = vadd.f32 %v407_v25, %v2339_v8  ;;  %v1278_v8 = vsub.f32 %v2528_v34, %v1277_v59  ;;  %s1657_s10 = sshll.u32 %s1888_s0, 4  ;;  %s1658_s10 = int_to_ptr.vmem [resolvable:$true] %s1657_s10 }
  0xe5   :  { %v499_v32 = vld [vmem:[#allocation2 + $0x38] sm:$0xff] }
  0xe6   :  { %v635_v33 = vadd.f32 %v613_v12, %v499_v32  ;;  %485 = vst.msk [vmem:[#allocation2 + $0x48] sm:$0xff] %vm140_vm1, %v469_v31  ;;  %1847 = vmatmul.msk.f32.gmra.mxu0 %vm32_vm0, %v1835_v27  ;;  %1855 = vmatmul.msk.f32.gmra.mxu1 %vm32_vm0, %v1835_v27  ;;  %v1279_v1 = vand.u32 4294901760, %v1278_v8  ;;  %v1285_v12 = vand.u32 4294901760, %v2549_v5 }
  0xe7   :  { %1264 = vmatmul.f32.gmra.mxu2 %v1263_v61  ;;  %1360 = vmatmul.f32.gmra.mxu3 %v2467_v44 }
  0xe8   :  { %651 = vst.msk [vmem:[#allocation2 + $0x38] sm:$0xff] %vm140_vm1, %v635_v33  ;;  %v339_v33 = vld [vmem:[#allocation2 + $0x78] sm:$0xff] }
  0xea   :  { %v575_v41 = vpop.f32.mrf.mxu2  ;;  %v616_v45 = vpop.f32.mrf.mxu3 }
  0xeb   :  { %v2533_v46 = vadd.f32 %v575_v41, %v468_v40  ;;  %v410_v38 = vpop.f32.mrf.mxu0  ;;  %v451_v50 = vpop.f32.mrf.mxu1 }
  0xec   :  { %v471_v2 = vadd.f32 %v451_v50, %v335_v49  ;;  %v470_v6 = vadd.f32 %v410_v38, %v2361_v7  ;;  %v1286_v7 = vsub.f32 %v2549_v5, %v1285_v12 }
  0xed   :  { %v501_v3 = vld [vmem:[#allocation2 + $0x48] sm:$0xff] }
  0xee   :  { %v637_v4 = vadd.f32 %v616_v45, %v501_v3  ;;  %487 = vst.msk [vmem:[#allocation2 + $0x58] sm:$0xff] %vm140_vm1, %v471_v2  ;;  %1848 = vmatmul.msk.f32.gmra.mxu0 %vm32_vm0, %v1836_v54  ;;  %1856 = vmatmul.msk.f32.gmra.mxu1 %vm32_vm0, %v1836_v54  ;;  %v1287_v40 = vand.u32 4294901760, %v1286_v7  ;;  %v661_v2 = vld [vmem:[#allocation2 + $0x8] sm:$0xff] }
  0xef   :  { %1272 = vmatmul.f32.gmra.mxu2 %v1271_v58  ;;  %1364 = vmatmul.f32.gmra.mxu3 %v2491_v13 }
  0xf0   :  { %653 = vst.msk [vmem:[#allocation2 + $0x48] sm:$0xff] %vm140_vm1, %v637_v4 }
  0xf2   :  { %v578_v14 = vpop.f32.mrf.mxu2  ;;  %v619_v16 = vpop.f32.mrf.mxu3 }
  0xf3   :  { %v2553_v55 = vadd.f32 %v578_v14, %v470_v6  ;;  %v413_v20 = vpop.f32.mrf.mxu0  ;;  %v454_v56 = vpop.f32.mrf.mxu1 }
  0xf4   :  { %v473_v25 = vadd.f32 %v454_v56, %v337_v21  ;;  %v472_v27 = vadd.f32 %v413_v20, %v2386_v42  ;;  %v663_v20 = vld [vmem:[#allocation2 + $0x18] sm:$0xff] }
  0xf5   :  { %v503_v52 = vld [vmem:[#allocation2 + $0x58] sm:$0xff] }
  0xf6   :  { %v639_v22 = vadd.f32 %v619_v16, %v503_v52  ;;  %489 = vst.msk [vmem:[#allocation2 + $0x68] sm:$0xff] %vm140_vm1, %v473_v25  ;;  %1849 = vmatmul.msk.f32.gmra.mxu0 %vm32_vm0, %v1837_v0  ;;  %1857 = vmatmul.msk.f32.gmra.mxu1 %vm32_vm0, %v1837_v0  ;;  %v665_v25 = vld [vmem:[#allocation2 + $0x28] sm:$0xff] }
  0xf7   :  { %1280 = vmatmul.f32.gmra.mxu2 %v1279_v1  ;;  %1368 = vmatmul.f32.gmra.mxu3 %v2515_v30 }
  0xf8   :  { %655 = vst.msk [vmem:[#allocation2 + $0x58] sm:$0xff] %vm140_vm1, %v639_v22 }
  0xfa   :  { %v581_v61 = vpop.f32.mrf.mxu2  ;;  %v622_v31 = vpop.f32.mrf.mxu3 }
  0xfb   :  { %v2568_v32 = vadd.f32 %v581_v61, %v472_v27  ;;  %v416_v15 = vpop.f32.mrf.mxu0  ;;  %v457_v17 = vpop.f32.mrf.mxu1  ;;  %v667_v61 = vld [vmem:[#allocation2 + $0x38] sm:$0xff] }
  0xfc   :  { %v475_v41 = vadd.f32 %v457_v17, %v339_v33  ;;  %v474_v42 = vadd.f32 %v416_v15, %v2413_v62 }
  0xfd   :  { %v505_v45 = vld [vmem:[#allocation2 + $0x68] sm:$0xff] }
  0xfe   :  { %v641_v38 = vadd.f32 %v622_v31, %v505_v45  ;;  %491 = vst.msk [vmem:[#allocation2 + $0x78] sm:$0xff] %vm140_vm1, %v475_v41  ;;  %1850 = vmatmul.msk.f32.gmra.mxu0 %vm32_vm0, %v1838_v39  ;;  %1858 = vmatmul.msk.f32.gmra.mxu1 %vm32_vm0, %v1838_v39  ;;  %v669_v39 = vld [vmem:[#allocation2 + $0x48] sm:$0xff] }
  0xff   :  { %1288 = vmatmul.f32.gmra.mxu2 %v1287_v40  ;;  %1372 = vmatmul.f32.gmra.mxu3 %v2539_v60 }
 0x100   :  { %657 = vst.msk [vmem:[#allocation2 + $0x68] sm:$0xff] %vm140_vm1, %v641_v38 }
 0x102   :  { %v584_v49 = vpop.f32.mrf.mxu2  ;;  %v625_v50 = vpop.f32.mrf.mxu3 }
 0x103   :  { %v2579_v54 = vadd.f32 %v584_v49, %v474_v42  ;;  %v2581_v58 = vpop.f32.mrf.mxu0  ;;  %v772_v3 = vpop.f32.mrf.mxu1  ;;  %v671_v42 = vld [vmem:[#allocation2 + $0x58] sm:$0xff] }
 0x104   :  { %v797_v4 = vadd.f32 %v772_v3, %v661_v2 }
 0x105   :  { %v507_v8 = vld [vmem:[#allocation2 + $0x78] sm:$0xff] }
 0x106   :  { %v643_v6 = vadd.f32 %v625_v50, %v507_v8  ;;  %813 = vst.msk [vmem:[#allocation2 + $0x8] sm:$0xff] %vm140_vm1, %v797_v4  ;;  %1408 = vmatmul.f32.vlgmr.msra.gmra.mxu0 %v2382_v37  ;;  %1473 = vmatmul.f32.vlgmr.msra.gmra.mxu1 %v1229_v47 }
 0x107   :  { %1557 = vmatmul.f32.vlgmr.msra.gmra.mxu2 %v2366_v35  ;;  %1613 = vmatmul.f32.vlgmr.msra.gmra.mxu3 %v2366_v35  ;;  %v673_v4 = vld [vmem:[#allocation2 + $0x68] sm:$0xff] }
 0x108   :  { %659 = vst.msk [vmem:[#allocation2 + $0x78] sm:$0xff] %vm140_vm1, %v643_v6 }
 0x10a   :  { %v2590_v62 = vpop.f32.mrf.mxu2  ;;  %v940_v14 = vpop.f32.mrf.mxu3 }
 0x10b   :  { %v2592_v16 = vpop.f32.mrf.mxu0  ;;  %v775_v21 = vpop.f32.mrf.mxu1 }
 0x10c   :  { %v799_v56 = vadd.f32 %v775_v21, %v663_v20 }
 0x10d   :  { %v829_v0 = vld [vmem:[#allocation2 + $0x8] sm:$0xff] }
 0x10e   :  { %v965_v1 = vadd.f32 %v940_v14, %v829_v0  ;;  %815 = vst.msk [vmem:[#allocation2 + $0x18] sm:$0xff] %vm140_vm1, %v799_v56  ;;  %1413 = vmatmul.f32.gmra.mxu0 %v2410_v57  ;;  %1479 = vmatmul.f32.gmra.mxu1 %v1237_v9 }
 0x10f   :  { %1561 = vmatmul.f32.gmra.mxu2 %v2392_v48  ;;  %1617 = vmatmul.f32.gmra.mxu3 %v2392_v48  ;;  %v675_v21 = vld [vmem:[#allocation2 + $0x78] sm:$0xff] }
 0x110   :  { %981 = vst.msk [vmem:[#allocation2 + $0x8] sm:$0xff] %vm140_vm1, %v965_v1 }
 0x112   :  { %v2601_v35 = vpop.f32.mrf.mxu2  ;;  %v943_v37 = vpop.f32.mrf.mxu3 }
 0x113   :  { %v2603_v47 = vpop.f32.mrf.mxu0  ;;  %v778_v52 = vpop.f32.mrf.mxu1 }
 0x114   :  { %v801_v22 = vadd.f32 %v778_v52, %v665_v25 }
 0x115   :  { %v831_v7 = vld [vmem:[#allocation2 + $0x18] sm:$0xff] }
 0x116   :  { %v967_v27 = vadd.f32 %v943_v37, %v831_v7  ;;  %817 = vst.msk [vmem:[#allocation2 + $0x28] sm:$0xff] %vm140_vm1, %v801_v22  ;;  %1418 = vmatmul.f32.gmra.mxu0 %v2433_v18  ;;  %1485 = vmatmul.f32.gmra.mxu1 %v1245_v26 }
 0x117   :  { %1565 = vmatmul.f32.gmra.mxu2 %v2419_v10  ;;  %1621 = vmatmul.f32.gmra.mxu3 %v2419_v10  ;;  %v997_v22 = vld [vmem:[#allocation2 + $0x8] sm:$0xff] }
 0x118   :  { %983 = vst.msk [vmem:[#allocation2 + $0x18] sm:$0xff] %vm140_vm1, %v967_v27 }
 0x11a   :  { %v2612_v48 = vpop.f32.mrf.mxu2  ;;  %v946_v57 = vpop.f32.mrf.mxu3 }
 0x11b   :  { %v2614_v9 = vpop.f32.mrf.mxu0  ;;  %v781_v31 = vpop.f32.mrf.mxu1 }
 0x11c   :  { %v803_v15 = vadd.f32 %v781_v31, %v667_v61 }
 0x11d   :  { %v833_v33 = vld [vmem:[#allocation2 + $0x28] sm:$0xff] }
 0x11e   :  { %v969_v17 = vadd.f32 %v946_v57, %v833_v33  ;;  %819 = vst.msk [vmem:[#allocation2 + $0x38] sm:$0xff] %vm140_vm1, %v803_v15  ;;  %1423 = vmatmul.f32.gmra.mxu0 %v2456_v29  ;;  %1491 = vmatmul.f32.gmra.mxu1 %v1253_v43 }
 0x11f   :  { %1569 = vmatmul.f32.gmra.mxu2 %v2443_v19  ;;  %1625 = vmatmul.f32.gmra.mxu3 %v2443_v19  ;;  %v999_v31 = vld [vmem:[#allocation2 + $0x18] sm:$0xff] }
 0x120   :  { %985 = vst.msk [vmem:[#allocation2 + $0x28] sm:$0xff] %vm140_vm1, %v969_v17 }
 0x122   :  { %v2623_v10 = vpop.f32.mrf.mxu2  ;;  %v949_v18 = vpop.f32.mrf.mxu3 }
 0x123   :  { %v2625_v26 = vpop.f32.mrf.mxu0  ;;  %v784_v40 = vpop.f32.mrf.mxu1 }
 0x124   :  { %v805_v41 = vadd.f32 %v784_v40, %v669_v39 }
 0x125   :  { %v835_v45 = vld [vmem:[#allocation2 + $0x38] sm:$0xff] }
 0x126   :  { %v971_v38 = vadd.f32 %v949_v18, %v835_v45  ;;  %821 = vst.msk [vmem:[#allocation2 + $0x48] sm:$0xff] %vm140_vm1, %v805_v41  ;;  %1428 = vmatmul.f32.gmra.mxu0 %v2480_v51  ;;  %1497 = vmatmul.f32.gmra.mxu1 %v1261_v11  ;;  %v800_v18 = vadd.f32 %v2603_v47, %v2485_v63 }
 0x127   :  { %1573 = vmatmul.f32.gmra.mxu2 %v2467_v44  ;;  %1629 = vmatmul.f32.gmra.mxu3 %v2467_v44  ;;  %v1001_v40 = vld [vmem:[#allocation2 + $0x28] sm:$0xff] }
 0x128   :  { %987 = vst.msk [vmem:[#allocation2 + $0x38] sm:$0xff] %vm140_vm1, %v971_v38 }
 0x12a   :  { %v2634_v19 = vpop.f32.mrf.mxu2  ;;  %v952_v29 = vpop.f32.mrf.mxu3 }
 0x12b   :  { %v2636_v43 = vpop.f32.mrf.mxu0  ;;  %v787_v49 = vpop.f32.mrf.mxu1 }
 0x12c   :  { %v807_v50 = vadd.f32 %v787_v49, %v671_v42 }
 0x12d   :  { %v837_v2 = vld [vmem:[#allocation2 + $0x48] sm:$0xff] }
 0x12e   :  { %v973_v3 = vadd.f32 %v952_v29, %v837_v2  ;;  %823 = vst.msk [vmem:[#allocation2 + $0x58] sm:$0xff] %vm140_vm1, %v807_v50  ;;  %1433 = vmatmul.f32.gmra.mxu0 %v2504_v53  ;;  %1503 = vmatmul.f32.gmra.mxu1 %v1269_v28  ;;  %v802_v29 = vadd.f32 %v2614_v9, %v2509_v24 }
 0x12f   :  { %1577 = vmatmul.f32.gmra.mxu2 %v2491_v13  ;;  %1633 = vmatmul.f32.gmra.mxu3 %v2491_v13  ;;  %v1003_v49 = vld [vmem:[#allocation2 + $0x38] sm:$0xff] }
 0x130   :  { %989 = vst.msk [vmem:[#allocation2 + $0x48] sm:$0xff] %vm140_vm1, %v973_v3  ;;  %v970_v42 = vadd.f32 %v2623_v10, %v802_v29 }
 0x132   :  { %v2645_v44 = vpop.f32.mrf.mxu2  ;;  %v955_v51 = vpop.f32.mrf.mxu3 }
 0x133   :  { %v2647_v11 = vpop.f32.mrf.mxu0  ;;  %v790_v8 = vpop.f32.mrf.mxu1 }
 0x134   :  { %v809_v6 = vadd.f32 %v790_v8, %v673_v4 }
 0x135   :  { %v839_v14 = vld [vmem:[#allocation2 + $0x58] sm:$0xff] }
 0x136   :  { %v975_v20 = vadd.f32 %v955_v51, %v839_v14  ;;  %825 = vst.msk [vmem:[#allocation2 + $0x68] sm:$0xff] %vm140_vm1, %v809_v6  ;;  %1438 = vmatmul.f32.gmra.mxu0 %v2528_v34  ;;  %1509 = vmatmul.f32.gmra.mxu1 %v1277_v59  ;;  %v804_v51 = vadd.f32 %v2625_v26, %v2533_v46 }
 0x137   :  { %1581 = vmatmul.f32.gmra.mxu2 %v2515_v30  ;;  %1637 = vmatmul.f32.gmra.mxu3 %v2515_v30  ;;  %v796_v30 = vadd.f32 %v2581_v58, %v2437_v23  ;;  %v798_v23 = vadd.f32 %v2592_v16, %v2461_v36  ;;  %v968_v36 = vadd.f32 %v2612_v48, %v800_v18  ;;  %v1005_v8 = vld [vmem:[#allocation2 + $0x48] sm:$0xff] }
 0x138   :  { %991 = vst.msk [vmem:[#allocation2 + $0x58] sm:$0xff] %vm140_vm1, %v975_v20  ;;  %v972_v4 = vadd.f32 %v2634_v19, %v804_v51 }
 0x139   :  { %v964_v34 = vadd.f32 %v2590_v62, %v796_v30  ;;  %v808_v30 = vadd.f32 %v2647_v11, %v2568_v32 }
 0x13a   :  { %v2656_v13 = vpop.f32.mrf.mxu2  ;;  %v958_v53 = vpop.f32.mrf.mxu3 }
 0x13b   :  { %v2658_v28 = vpop.f32.mrf.mxu0  ;;  %v793_v56 = vpop.f32.mrf.mxu1 }
 0x13c   :  { %v811_v0 = vadd.f32 %v793_v56, %v675_v21 }
 0x13d   :  { %v841_v1 = vld [vmem:[#allocation2 + $0x68] sm:$0xff] }
 0x13e   :  { %v977_v37 = vadd.f32 %v958_v53, %v841_v1  ;;  %827 = vst.msk [vmem:[#allocation2 + $0x78] sm:$0xff] %vm140_vm1, %v811_v0  ;;  %1443 = vmatmul.f32.gmra.mxu0 %v2549_v5  ;;  %1515 = vmatmul.f32.gmra.mxu1 %v1285_v12  ;;  %v806_v53 = vadd.f32 %v2636_v43, %v2553_v55 }
 0x13f   :  { %1585 = vmatmul.f32.gmra.mxu2 %v2539_v60  ;;  %1641 = vmatmul.f32.gmra.mxu3 %v2539_v60  ;;  %v966_v60 = vadd.f32 %v2601_v35, %v798_v23  ;;  %v1007_v56 = vld [vmem:[#allocation2 + $0x58] sm:$0xff] }
 0x140   :  { %993 = vst.msk [vmem:[#allocation2 + $0x68] sm:$0xff] %vm140_vm1, %v977_v37  ;;  %v974_v21 = vadd.f32 %v2645_v44, %v806_v53 }
 0x142   :  { %v2670_v59 = vpop.f32.mrf.mxu2  ;;  %v961_v25 = vpop.f32.mrf.mxu3 }
 0x143   :  { %v1067_v52 = vpop.f32.mrf.mxu0  ;;  %v1108_v7 = vpop.f32.mrf.mxu1 }
 0x144   :  { %v1132_v27 = vadd.f32 %v1067_v52, %v964_v34  ;;  %v1133_v5 = vadd.f32 %v1108_v7, %v997_v22  ;;  %v976_v34 = vadd.f32 %v2656_v13, %v808_v30 }
 0x145   :  { %v843_v12 = vld [vmem:[#allocation2 + $0x78] sm:$0xff] }
 0x146   :  { %v979_v57 = vadd.f32 %v961_v25, %v843_v12  ;;  %1148 = vst [vmem:[#allocation2] sm:$0xff] %v1132_v27  ;;  %v810_v27 = vadd.f32 %v2658_v28, %v2579_v54 }
 0x147   :  { %1149 = vst.msk [vmem:[#allocation2 + $0x8] sm:$0xff] %vm140_vm1, %v1133_v5  ;;  %v1009_v25 = vld [vmem:[#allocation2 + $0x68] sm:$0xff] }
 0x148   :  { %995 = vst.msk [vmem:[#allocation2 + $0x78] sm:$0xff] %vm140_vm1, %v979_v57  ;;  %v978_v32 = vadd.f32 %v2670_v59, %v810_v27 }
 0x14a   :  { %v2677_v58 = vpop.f32.mrf.mxu2  ;;  %v2679_v62 = vpop.f32.mrf.mxu3 }
 0x14b   :  { %v1070_v61 = vpop.f32.mrf.mxu0  ;;  %v1111_v15 = vpop.f32.mrf.mxu1  ;;  %v1346_v59 = vadd.f32 %v2679_v62, %v2677_v58 }
 0x14c   :  { %v1134_v33 = vadd.f32 %v1070_v61, %v966_v60  ;;  %v1135_v17 = vadd.f32 %v1111_v15, %v999_v31 }
 0x14e   :  { %1150 = vst [vmem:[#allocation2 + $0x10] sm:$0xff] %v1134_v33 }
 0x14f   :  { %1151 = vst.msk [vmem:[#allocation2 + $0x18] sm:$0xff] %vm140_vm1, %v1135_v17  ;;  %v1011_v12 = vld [vmem:[#allocation2 + $0x78] sm:$0xff] }
 0x152   :  { %v2685_v16 = vpop.f32.mrf.mxu2  ;;  %v2687_v35 = vpop.f32.mrf.mxu3 }
 0x153   :  { %v1073_v39 = vpop.f32.mrf.mxu0  ;;  %v1114_v41 = vpop.f32.mrf.mxu1 }
 0x154   :  { %v1136_v45 = vadd.f32 %v1073_v39, %v968_v36  ;;  %v1137_v38 = vadd.f32 %v1114_v41, %v1001_v40  ;;  %v1350_v36 = vadd.f32 %v2687_v35, %v2685_v16 }
 0x156   :  { %1152 = vst [vmem:[#allocation2 + $0x20] sm:$0xff] %v1136_v45 }
 0x157   :  { %1153 = vst.msk [vmem:[#allocation2 + $0x28] sm:$0xff] %vm140_vm1, %v1137_v38 }
 0x15a   :  { %v2693_v63 = vpop.f32.mrf.mxu2  ;;  %v2695_v47 = vpop.f32.mrf.mxu3 }
 0x15b   :  { %v1076_v48 = vpop.f32.mrf.mxu0  ;;  %v1117_v50 = vpop.f32.mrf.mxu1 }
 0x15c   :  { %v1138_v2 = vadd.f32 %v1076_v48, %v970_v42  ;;  %v1139_v3 = vadd.f32 %v1117_v50, %v1003_v49  ;;  %v1354_v42 = vadd.f32 %v2695_v47, %v2693_v63 }
 0x15e   :  { %1154 = vst [vmem:[#allocation2 + $0x30] sm:$0xff] %v1138_v2 }
 0x15f   :  { %1155 = vst.msk [vmem:[#allocation2 + $0x38] sm:$0xff] %vm140_vm1, %v1139_v3 }
 0x162   :  { %v2701_v24 = vpop.f32.mrf.mxu2  ;;  %v2703_v9 = vpop.f32.mrf.mxu3 }
 0x163   :  { %v1079_v10 = vpop.f32.mrf.mxu0  ;;  %v1120_v6 = vpop.f32.mrf.mxu1 }
 0x164   :  { %v1140_v14 = vadd.f32 %v1079_v10, %v972_v4  ;;  %v1141_v20 = vadd.f32 %v1120_v6, %v1005_v8  ;;  %v1358_v4 = vadd.f32 %v2703_v9, %v2701_v24 }
 0x166   :  { %1156 = vst [vmem:[#allocation2 + $0x40] sm:$0xff] %v1140_v14 }
 0x167   :  { %1157 = vst.msk [vmem:[#allocation2 + $0x48] sm:$0xff] %vm140_vm1, %v1141_v20 }
 0x16a   :  { %v2709_v46 = vpop.f32.mrf.mxu2  ;;  %v2711_v26 = vpop.f32.mrf.mxu3 }
 0x16b   :  { %v1082_v19 = vpop.f32.mrf.mxu0  ;;  %v1123_v0 = vpop.f32.mrf.mxu1 }
 0x16c   :  { %v1142_v1 = vadd.f32 %v1082_v19, %v974_v21  ;;  %v1143_v37 = vadd.f32 %v1123_v0, %v1007_v56  ;;  %v1362_v21 = vadd.f32 %v2711_v26, %v2709_v46 }
 0x16e   :  { %1158 = vst [vmem:[#allocation2 + $0x50] sm:$0xff] %v1142_v1 }
 0x16f   :  { %1159 = vst.msk [vmem:[#allocation2 + $0x58] sm:$0xff] %vm140_vm1, %v1143_v37 }
 0x172   :  { %v2717_v55 = vpop.f32.mrf.mxu2  ;;  %v2719_v43 = vpop.f32.mrf.mxu3 }
 0x173   :  { %v1085_v44 = vpop.f32.mrf.mxu0  ;;  %v1126_v52 = vpop.f32.mrf.mxu1 }
 0x174   :  { %v1144_v22 = vadd.f32 %v1085_v44, %v976_v34  ;;  %v1145_v7 = vadd.f32 %v1126_v52, %v1009_v25  ;;  %v1366_v34 = vadd.f32 %v2719_v43, %v2717_v55 }
 0x176   :  { %1160 = vst [vmem:[#allocation2 + $0x60] sm:$0xff] %v1144_v22 }
 0x177   :  { %1161 = vst.msk [vmem:[#allocation2 + $0x68] sm:$0xff] %vm140_vm1, %v1145_v7 }
 0x17a   :  { %v2728_v11 = vpop.f32.mrf.mxu2  ;;  %v2730_v13 = vpop.f32.mrf.mxu3 }
 0x17b   :  { %v1088_v5 = vpop.f32.mrf.mxu0  ;;  %v1129_v57 = vpop.f32.mrf.mxu1 }
 0x17c   :  { %v1146_v23 = vadd.f32 %v1088_v5, %v978_v32  ;;  %v1147_v60 = vadd.f32 %v1129_v57, %v1011_v12  ;;  %v1370_v32 = vadd.f32 %v2730_v13, %v2728_v11 }
 0x17e   :  { %1162 = vst [vmem:[#allocation2 + $0x70] sm:$0xff] %v1146_v23 }
 0x17f   :  { %1163 = vst.msk [vmem:[#allocation2 + $0x78] sm:$0xff] %vm140_vm1, %v1147_v60 }
 0x180   :  { %1665 = dma.vmem_to_hbm [thread:$0]  %s1658_s10, 2048, %s1660_s13, [#allocation3], %s1889_s14, %s1889_s14, %s1890_s15  }
 0x182   :  { %v2733_v54 = vpop.f32.mrf.mxu2  ;;  %v2735_v28 = vpop.f32.mrf.mxu3 }
 0x183   :  { %v1409_v61 = vpop.f32.mrf.mxu0  ;;  %v1474_v31 = vpop.f32.mrf.mxu1 }
 0x184   :  { %v1410_v15 = vadd.f32 %v1409_v61, %v1346_v59  ;;  %v1374_v61 = vadd.f32 %v2735_v28, %v2733_v54 }
 0x186   :  { %v1475_v33 = vadd.f32 %v1474_v31, %v1410_v15 }
 0x18a   :  { %v1558_v17 = vpop.f32.mrf.mxu2  ;;  %v1614_v18 = vpop.f32.mrf.mxu3 }
 0x18b   :  { %v1559_v39 = vadd.f32 %v1558_v17, %v1475_v33  ;;  %v1414_v40 = vpop.f32.mrf.mxu0  ;;  %v1480_v41 = vpop.f32.mrf.mxu1 }
 0x18c   :  { %v1415_v45 = vadd.f32 %v1414_v40, %v1350_v36 }
 0x18d   :  { %v1615_v38 = vadd.f32 %v1614_v18, %v1559_v39 }
 0x18e   :  { %v1481_v58 = vadd.f32 %v1480_v41, %v1415_v45 }
 0x18f   :  { %1645 = vst.msk [vmem:[%s2790_s5] sm:$0xff] %vm1179_vm2, %v1615_v38 }
 0x192   :  { %v1562_v62 = vpop.f32.mrf.mxu2  ;;  %v1618_v29 = vpop.f32.mrf.mxu3 }
 0x193   :  { %v1563_v48 = vadd.f32 %v1562_v62, %v1481_v58  ;;  %v1419_v49 = vpop.f32.mrf.mxu0  ;;  %v1486_v50 = vpop.f32.mrf.mxu1 }
 0x194   :  { %v1420_v16 = vadd.f32 %v1419_v49, %v1354_v42 }
 0x195   :  { %v1619_v35 = vadd.f32 %v1618_v29, %v1563_v48 }
 0x196   :  { %v1487_v2 = vadd.f32 %v1486_v50, %v1420_v16 }
 0x197   :  { %1646 = vst.msk [vmem:[%s2790_s5 + $0x8] sm:$0xff] %vm1179_vm2, %v1619_v35 }
 0x19a   :  { %v1566_v3 = vpop.f32.mrf.mxu2  ;;  %v1622_v51 = vpop.f32.mrf.mxu3 }
 0x19b   :  { %v1567_v10 = vadd.f32 %v1566_v3, %v1487_v2  ;;  %v1424_v8 = vpop.f32.mrf.mxu0  ;;  %v1492_v6 = vpop.f32.mrf.mxu1 }
 0x19c   :  { %v1425_v63 = vadd.f32 %v1424_v8, %v1358_v4 }
 0x19d   :  { %v1623_v47 = vadd.f32 %v1622_v51, %v1567_v10 }
 0x19e   :  { %v1493_v14 = vadd.f32 %v1492_v6, %v1425_v63 }
 0x19f   :  { %1647 = vst.msk [vmem:[%s2790_s5 + $0x10] sm:$0xff] %vm1179_vm2, %v1623_v47 }
 0x1a2   :  { %v1570_v20 = vpop.f32.mrf.mxu2  ;;  %v1626_v53 = vpop.f32.mrf.mxu3 }
 0x1a3   :  { %v1571_v19 = vadd.f32 %v1570_v20, %v1493_v14  ;;  %v1429_v56 = vpop.f32.mrf.mxu0  ;;  %v1498_v0 = vpop.f32.mrf.mxu1 }
 0x1a4   :  { %v1430_v24 = vadd.f32 %v1429_v56, %v1362_v21 }
 0x1a5   :  { %v1627_v9 = vadd.f32 %v1626_v53, %v1571_v19 }
 0x1a6   :  { %v1499_v1 = vadd.f32 %v1498_v0, %v1430_v24 }
 0x1a7   :  { %1648 = vst.msk [vmem:[%s2790_s5 + $0x18] sm:$0xff] %vm1179_vm2, %v1627_v9 }
 0x1aa   :  { %v1574_v37 = vpop.f32.mrf.mxu2  ;;  %v1630_v30 = vpop.f32.mrf.mxu3 }
 0x1ab   :  { %v1575_v44 = vadd.f32 %v1574_v37, %v1499_v1  ;;  %v1434_v25 = vpop.f32.mrf.mxu0  ;;  %v1504_v52 = vpop.f32.mrf.mxu1 }
 0x1ac   :  { %v1435_v46 = vadd.f32 %v1434_v25, %v1366_v34 }
 0x1ad   :  { %v1631_v26 = vadd.f32 %v1630_v30, %v1575_v44 }
 0x1ae   :  { %v1505_v22 = vadd.f32 %v1504_v52, %v1435_v46 }
 0x1af   :  { %1649 = vst.msk [vmem:[%s2790_s5 + $0x20] sm:$0xff] %vm1179_vm2, %v1631_v26 }
 0x1b2   :  { %v1578_v7 = vpop.f32.mrf.mxu2  ;;  %v1634_v27 = vpop.f32.mrf.mxu3 }
 0x1b3   :  { %v1579_v5 = vadd.f32 %v1578_v7, %v1505_v22  ;;  %v1439_v12 = vpop.f32.mrf.mxu0  ;;  %v1510_v57 = vpop.f32.mrf.mxu1 }
 0x1b4   :  { %v1440_v55 = vadd.f32 %v1439_v12, %v1370_v32 }
 0x1b5   :  { %v1635_v43 = vadd.f32 %v1634_v27, %v1579_v5 }
 0x1b6   :  { %v1511_v23 = vadd.f32 %v1510_v57, %v1440_v55 }
 0x1b7   :  { %1650 = vst.msk [vmem:[%s2790_s5 + $0x28] sm:$0xff] %vm1179_vm2, %v1635_v43 }
 0x1ba   :  { %v1582_v60 = vpop.f32.mrf.mxu2  ;;  %v1638_v59 = vpop.f32.mrf.mxu3 }
 0x1bb   :  { %v1583_v31 = vadd.f32 %v1582_v60, %v1511_v23  ;;  %v1444_v15 = vpop.f32.mrf.mxu0  ;;  %v1516_v13 = vpop.f32.mrf.mxu1 }
 0x1bc   :  { %v1445_v33 = vadd.f32 %v1444_v15, %v1374_v61 }
 0x1bd   :  { %v1639_v11 = vadd.f32 %v1638_v59, %v1583_v31 }
 0x1be   :  { %v1517_v17 = vadd.f32 %v1516_v13, %v1445_v33 }
 0x1bf   :  { %1651 = vst.msk [vmem:[%s2790_s5 + $0x30] sm:$0xff] %vm1179_vm2, %v1639_v11 }
 0x1c2   :  { %v1586_v18 = vpop.f32.mrf.mxu2  ;;  %v1642_v36 = vpop.f32.mrf.mxu3 }
 0x1c3   :  { %v1587_v39 = vadd.f32 %v1586_v18, %v1517_v17 }
 0x1c5   :  { %v1643_v40 = vadd.f32 %v1642_v36, %v1587_v39 }
 0x1c7   :  { %1652 = vst.msk [vmem:[%s2790_s5 + $0x38] sm:$0xff] %vm1179_vm2, %v1643_v40 }
 0x1c8   :  { %1886 = dma.done.wait [#allocation3], 2048  }
 0x1c9   :  { %1887 = vsyncadd [#allocation3], 4294965248 }
 0x1ca   :  { %1674 = vsyncpa [#allocation3], 1 }

</bundles_post_ra>
